<compile_context>
chip_gen: v7x
topology: tpu7x:2x2x1
jax: 0.10.0
libtpu: 0.0.40
codegen_flags: <defaults>
</compile_context>

<pallas_src>
import functools

import jax
import jax.numpy as jnp
from jax import lax
from jax.experimental import pallas as pl
from jax.experimental.pallas import tpu as pltpu


# ----------------------------------------------------------------------------
# Fused kernel: InfinityNorm weight rescale + 3x3 "same" conv + bias.
#
#   x_ref  : [1, Cin, H*W]          (one image, spatial flattened onto lanes)
#   w_ref  : [Cout, Cin*KH*KW]      (w_bar flattened, PyTorch OIHW order)
#   b_ref  : [Cout, 1]
#   o_ref  : [1, Cout, H*W]         (lane-dense output block)
#   xs_ref : [Cin, H*W + 2*PAD]     (VMEM scratch: zero halo + image interior)
# ----------------------------------------------------------------------------
def _fused_infnorm_conv_kernel(x_ref, w_ref, b_ref, o_ref, xs_ref, *,
                               H, W, KH, KW, pad_lanes):
    Cin = x_ref.shape[1]
    Cout = o_ref.shape[1]
    L = H * W

    # ---- 1. InfinityNorm weight rescale (weights are tiny; fused here) ----
    w2d = w_ref[...].astype(jnp.float32)                 # [Cout, Cin*KH*KW]
    rowsum = jnp.sum(w2d, axis=1, keepdims=True)         # [Cout, 1]
    avg = jnp.mean(rowsum)                               # scalar
    scale = jnp.minimum(jnp.ones_like(rowsum), avg / rowsum)
    wm = w2d * scale                                     # scaled weights

    # ---- 2. zero halos + lane-flattened interior copy ---------------------
    # Interior lives at lane offset `pad_lanes` (a multiple of 128), so the
    # halo zero-fills and the interior copy are all lane-tile-aligned stores.
    # Reads that run off the top/bottom image rows land in the zero halo.
    xs_ref[:, :pad_lanes] = jnp.zeros((Cin, pad_lanes), xs_ref.dtype)
    xs_ref[:, pad_lanes + L:] = jnp.zeros(
        (Cin, xs_ref.shape[1] - (pad_lanes + L)), xs_ref.dtype)
    xs_ref[:, pad_lanes:pad_lanes + L] = x_ref[0].astype(jnp.float32)

    # Column-validity masks, hoisted out of the tap loop (row out-of-bounds is
    # handled by the zero halo; column wrap-around to the neighbouring image
    # row must be masked).
    col = lax.broadcasted_iota(jnp.int32, (1, L), 1) % W
    col_mask = {}
    for ox in range(-(KW // 2), KW // 2 + 1):
        if ox < 0:
            col_mask[ox] = col >= -ox
        elif ox > 0:
            col_mask[ox] = col < (W - ox)

    # ---- 3. 3x3 conv: 9 shifted lane-slices, broadcast-MAC over channels ---
    acc = jnp.zeros((Cout, L), jnp.float32)
    for dy in range(KH):
        oy = dy - KH // 2
        for dx in range(KW):
            ox = dx - KW // 2
            s = oy * W + ox                               # static flat shift
            tap = xs_ref[:, pad_lanes + s:pad_lanes + s + L]   # [Cin, L]
            if ox != 0:
                tap = jnp.where(col_mask[ox], tap, 0.0)
            for ci in range(Cin):
                k = (ci * KH + dy) * KW + dx              # OIHW flat index
                acc = acc + wm[:, k:k + 1] * tap[ci:ci + 1, :]

    # ---- 4. bias + lane-dense store ----------------------------------------
    o_ref[0] = (acc + b_ref[...]).astype(o_ref.dtype)     # [Cout,1] broadcast


# ----------------------------------------------------------------------------
# Wrapper: InfinityNorm(Conv2d).forward(x) -- NCHW in, NCHW out.
# ----------------------------------------------------------------------------
def infinity_norm_conv2d(x_nchw, w_bar, bias, padding=1):
    N, Cin, H, W = x_nchw.shape
    Cout, Cin_w, KH, KW = w_bar.shape
    assert Cin == Cin_w
    assert padding == KH // 2 == KW // 2, "module uses 'same' 3x3 conv"

    L = H * W
    PAD = 128                                  # lane-tile aligned zero halo

    # Free (trailing-dim) reshapes only -- no transposes, no jnp.pad.
    x_flat = x_nchw.reshape(N, Cin, L)
    w2d = w_bar.reshape(Cout, Cin * KH * KW)
    b_col = bias.reshape(Cout, 1)

    kernel = functools.partial(_fused_infnorm_conv_kernel,
                               H=H, W=W, KH=KH, KW=KW, pad_lanes=PAD)

    out_flat = pl.pallas_call(
        kernel,
        out_shape=jax.ShapeDtypeStruct((N, Cout, L), x_nchw.dtype),
        grid_spec=pltpu.PrefetchScalarGridSpec(
            num_scalar_prefetch=0,
            grid=(N,),
            in_specs=[
                pl.BlockSpec((1, Cin, L), lambda n: (n, 0, 0)),
                pl.BlockSpec((Cout, Cin * KH * KW), lambda n: (0, 0)),
                pl.BlockSpec((Cout, 1), lambda n: (0, 0)),
            ],
            out_specs=pl.BlockSpec((1, Cout, L), lambda n: (n, 0, 0)),
            scratch_shapes=[pltpu.VMEM((Cin, L + 2 * PAD), jnp.float32)],
        ),
        compiler_params=pltpu.CompilerParams(
            dimension_semantics=("parallel",),        # v7x: shard batch on 2 TCs
            vmem_limit_bytes=32 * 1024 * 1024,
        ),
    )(x_flat, w2d, b_col)

    return out_flat.reshape(N, Cout, H, W)     # free trailing-dim split


# ----------------------------------------------------------------------------
# Pure-JAX reference of the full PyTorch forward (correctness check only).
# ----------------------------------------------------------------------------
def reference_forward(x_nchw, w_bar, bias, padding=1):
    Cout = w_bar.shape[0]
    rowsum = jnp.sum(w_bar.reshape(Cout, -1), axis=1)
    avg = jnp.mean(rowsum)
    scale = jnp.minimum(jnp.ones_like(rowsum), avg / rowsum)
    w = w_bar * scale[:, None, None, None]
    y = jax.lax.conv_general_dilated(
        x_nchw, w, window_strides=(1, 1),
        padding=[(padding, padding), (padding, padding)],
        dimension_numbers=("NCHW", "OIHW", "NCHW"))
    return y + bias[None, :, None, None]


if __name__ == "__main__":
    key = jax.random.PRNGKey(0)
    kx, kw, kb = jax.random.split(key, 3)

    # Wrapped module: Conv2d(in_channels=4, out_channels=8, kernel=3, padding=1)
    N, Cin, H, W = 2, 4, 16, 16
    Cout, KH, KW = 8, 3, 3

    x = jax.random.normal(kx, (N, Cin, H, W), dtype=jnp.float32)
    w_bar = jax.random.normal(kw, (Cout, Cin, KH, KW), dtype=jnp.float32) * 0.1
    bias = jax.random.normal(kb, (Cout,), dtype=jnp.float32) * 0.1

    out = jax.block_until_ready(infinity_norm_conv2d(x, w_bar, bias, padding=1))
    ref = jax.block_until_ready(reference_forward(x, w_bar, bias, padding=1))

    assert out.shape == (N, Cout, H, W)
    assert jnp.allclose(out, ref, atol=1e-4, rtol=1e-4), "mismatch vs reference"

    print("KERNEL_OK")
</pallas_src>

<mosaic_0001>
module attributes {stable_mosaic.version = 11 : i64} {
  func.func @_fused_infnorm_conv_kernel(%arg0: i32, %arg1: memref<1x4x256xf32, #tpu.memory_space<vmem>>, %arg2: memref<8x36xf32, #tpu.memory_space<vmem>>, %arg3: memref<8x1xf32, #tpu.memory_space<vmem>>, %arg4: memref<1x8x256xf32, #tpu.memory_space<vmem>>, %arg5: memref<4x512xf32, #tpu.memory_space<vmem>>) attributes {dimension_semantics = [#tpu.dimension_semantics<parallel>], iteration_bounds = array<i64: 2>, scalar_prefetch = 0 : i64, scratch_operands = 1 : i64, tpu.core_type = #tpu.core_type<tc>, window_params = [{transform_indices = @transform_0, window_bounds = array<i64: 1, 4, 256>}, {pipeline_mode = #tpu.pipeline_mode<synchronous>, transform_indices = @transform_1, window_bounds = array<i64: 8, 36>}, {pipeline_mode = #tpu.pipeline_mode<synchronous>, transform_indices = @transform_2, window_bounds = array<i64: 8, 1>}, {transform_indices = @transform_3, window_bounds = array<i64: 1, 8, 256>}]} {
    %c0 = arith.constant 0 : index
    %c0_0 = arith.constant 0 : index
    %0 = vector.load %arg2[%c0, %c0_0] : memref<8x36xf32, #tpu.memory_space<vmem>>, vector<8x36xf32>
    %cst = arith.constant dense<0.000000e+00> : vector<8xf32>
    %1 = vector.multi_reduction <add>, %0, %cst [1] : vector<8x36xf32> to vector<8xf32>
    %2 = vector.shape_cast %1 : vector<8xf32> to vector<8x1xf32>
    %3 = vector.shape_cast %2 : vector<8x1xf32> to vector<1x8x1xf32>
    %cst_1 = arith.constant dense<0.000000e+00> : vector<1xf32>
    %4 = vector.multi_reduction <add>, %3, %cst_1 [1, 2] : vector<1x8x1xf32> to vector<1xf32>
    %5 = vector.shape_cast %4 : vector<1xf32> to vector<1x1x1xf32>
    %6 = vector.extract %5[0, 0, 0] : f32 from vector<1x1x1xf32>
    %cst_2 = arith.constant 8.000000e+00 : f32
    %7 = arith.divf %6, %cst_2 : f32
    %cst_3 = arith.constant 1.000000e+00 : f32
    %8 = vector.broadcast %cst_3 : f32 to vector<8x1xf32>
    %9 = vector.broadcast %7 : f32 to vector<8x1xf32>
    %10 = arith.divf %9, %2 : vector<8x1xf32>
    %11 = arith.minimumf %8, %10 : vector<8x1xf32>
    %12 = vector.broadcast %11 : vector<8x1xf32> to vector<8x36xf32>
    %13 = arith.mulf %0, %12 : vector<8x36xf32>
    %cst_4 = arith.constant 0.000000e+00 : f32
    %14 = vector.broadcast %cst_4 : f32 to vector<4x128xf32>
    %c0_5 = arith.constant 0 : index
    %c0_6 = arith.constant 0 : index
    %15 = vector.load %arg5[%c0_5, %c0_6] : memref<4x512xf32, #tpu.memory_space<vmem>>, vector<4x128xf32>
    tpu.vector_store %arg5[%c0_5, %c0_6], %14 {strides = array<i32>} : memref<4x512xf32, #tpu.memory_space<vmem>>, vector<4x128xf32>,
    %cst_7 = arith.constant 0.000000e+00 : f32
    %16 = vector.broadcast %cst_7 : f32 to vector<4x128xf32>
    %c0_8 = arith.constant 0 : index
    %c384 = arith.constant 384 : index
    %17 = vector.load %arg5[%c0_8, %c384] : memref<4x512xf32, #tpu.memory_space<vmem>>, vector<4x128xf32>
    tpu.vector_store %arg5[%c0_8, %c384], %16 {strides = array<i32>} : memref<4x512xf32, #tpu.memory_space<vmem>>, vector<4x128xf32>,
    %c0_9 = arith.constant 0 : index
    %c0_10 = arith.constant 0 : index
    %c0_11 = arith.constant 0 : index
    %18 = vector.load %arg1[%c0_9, %c0_10, %c0_11] : memref<1x4x256xf32, #tpu.memory_space<vmem>>, vector<1x4x256xf32>
    %19 = vector.shape_cast %18 : vector<1x4x256xf32> to vector<4x256xf32>
    %c0_12 = arith.constant 0 : index
    %c128 = arith.constant 128 : index
    %20 = vector.load %arg5[%c0_12, %c128] : memref<4x512xf32, #tpu.memory_space<vmem>>, vector<4x256xf32>
    tpu.vector_store %arg5[%c0_12, %c128], %19 {strides = array<i32>} : memref<4x512xf32, #tpu.memory_space<vmem>>, vector<4x256xf32>,
    %21 = tpu.iota {dimensions = array<i32: 1>} : vector<1x256xi32>
    %c16_i32 = arith.constant 16 : i32
    %c0_i32 = arith.constant 0 : i32
    %22 = arith.cmpi eq, %c16_i32, %c0_i32 : i32
    %c1_i32 = arith.constant 1 : i32
    %23 = arith.select %22, %c1_i32, %c16_i32 : i32
    %24 = vector.broadcast %23 : i32 to vector<1x256xi32>
    %25 = arith.remsi %21, %24 : vector<1x256xi32>
    %c0_i32_13 = arith.constant 0 : i32
    %26 = vector.broadcast %c0_i32_13 : i32 to vector<1x256xi32>
    %27 = arith.cmpi ne, %25, %26 : vector<1x256xi32>
    %c0_i32_14 = arith.constant 0 : i32
    %28 = vector.broadcast %c0_i32_14 : i32 to vector<1x256xi32>
    %29 = arith.cmpi slt, %25, %28 : vector<1x256xi32>
    %c0_i32_15 = arith.constant 0 : i32
    %30 = arith.cmpi slt, %23, %c0_i32_15 : i32
    %31 = vector.broadcast %30 : i1 to vector<1x256xi1>
    %32 = vector.broadcast %31 : vector<1x256xi1> to vector<1x256xi1>
    %33 = arith.xori %29, %32 : vector<1x256xi1>
    %34 = arith.andi %33, %27 : vector<1x256xi1>
    %35 = vector.broadcast %23 : i32 to vector<1x256xi32>
    %36 = arith.addi %25, %35 : vector<1x256xi32>
    %37 = arith.select %34, %36, %25 : vector<1x256xi1>, vector<1x256xi32>
    %c1_i32_16 = arith.constant 1 : i32
    %38 = vector.broadcast %c1_i32_16 : i32 to vector<1x256xi32>
    %39 = arith.cmpi sge, %37, %38 : vector<1x256xi32>
    %c15_i32 = arith.constant 15 : i32
    %40 = vector.broadcast %c15_i32 : i32 to vector<1x256xi32>
    %41 = arith.cmpi slt, %37, %40 : vector<1x256xi32>
    %cst_17 = arith.constant 0.000000e+00 : f32
    %42 = vector.broadcast %cst_17 : f32 to vector<8x256xf32>
    %c0_18 = arith.constant 0 : index
    %c111 = arith.constant 111 : index
    %43 = vector.load %arg5[%c0_18, %c111] : memref<4x512xf32, #tpu.memory_space<vmem>>, vector<4x256xf32>
    %cst_19 = arith.constant 0.000000e+00 : f32
    %44 = vector.shape_cast %39 : vector<1x256xi1> to vector<1x256xi1>
    %45 = vector.broadcast %44 : vector<1x256xi1> to vector<4x256xi1>
    %46 = vector.broadcast %cst_19 : f32 to vector<4x256xf32>
    %47 = arith.select %45, %43, %46 : vector<4x256xi1>, vector<4x256xf32>
    %48 = vector.extract_strided_slice %13 {offsets = [0, 0], sizes = [8, 1], strides = [1, 1]} : vector<8x36xf32> to vector<8x1xf32>
    %49 = vector.extract_strided_slice %47 {offsets = [0, 0], sizes = [1, 256], strides = [1, 1]} : vector<4x256xf32> to vector<1x256xf32>
    %50 = vector.broadcast %48 : vector<8x1xf32> to vector<8x256xf32>
    %51 = vector.broadcast %49 : vector<1x256xf32> to vector<8x256xf32>
    %52 = arith.mulf %50, %51 : vector<8x256xf32>
    %53 = arith.addf %42, %52 : vector<8x256xf32>
    %54 = vector.extract_strided_slice %13 {offsets = [0, 9], sizes = [8, 1], strides = [1, 1]} : vector<8x36xf32> to vector<8x1xf32>
    %55 = vector.extract_strided_slice %47 {offsets = [1, 0], sizes = [1, 256], strides = [1, 1]} : vector<4x256xf32> to vector<1x256xf32>
    %56 = vector.broadcast %54 : vector<8x1xf32> to vector<8x256xf32>
    %57 = vector.broadcast %55 : vector<1x256xf32> to vector<8x256xf32>
    %58 = arith.mulf %56, %57 : vector<8x256xf32>
    %59 = arith.addf %53, %58 : vector<8x256xf32>
    %60 = vector.extract_strided_slice %13 {offsets = [0, 18], sizes = [8, 1], strides = [1, 1]} : vector<8x36xf32> to vector<8x1xf32>
    %61 = vector.extract_strided_slice %47 {offsets = [2, 0], sizes = [1, 256], strides = [1, 1]} : vector<4x256xf32> to vector<1x256xf32>
    %62 = vector.broadcast %60 : vector<8x1xf32> to vector<8x256xf32>
    %63 = vector.broadcast %61 : vector<1x256xf32> to vector<8x256xf32>
    %64 = arith.mulf %62, %63 : vector<8x256xf32>
    %65 = arith.addf %59, %64 : vector<8x256xf32>
    %66 = vector.extract_strided_slice %13 {offsets = [0, 27], sizes = [8, 1], strides = [1, 1]} : vector<8x36xf32> to vector<8x1xf32>
    %67 = vector.extract_strided_slice %47 {offsets = [3, 0], sizes = [1, 256], strides = [1, 1]} : vector<4x256xf32> to vector<1x256xf32>
    %68 = vector.broadcast %66 : vector<8x1xf32> to vector<8x256xf32>
    %69 = vector.broadcast %67 : vector<1x256xf32> to vector<8x256xf32>
    %70 = arith.mulf %68, %69 : vector<8x256xf32>
    %71 = arith.addf %65, %70 : vector<8x256xf32>
    %c0_20 = arith.constant 0 : index
    %c112 = arith.constant 112 : index
    %72 = vector.load %arg5[%c0_20, %c112] : memref<4x512xf32, #tpu.memory_space<vmem>>, vector<4x256xf32>
    %73 = vector.extract_strided_slice %13 {offsets = [0, 1], sizes = [8, 1], strides = [1, 1]} : vector<8x36xf32> to vector<8x1xf32>
    %74 = vector.extract_strided_slice %72 {offsets = [0, 0], sizes = [1, 256], strides = [1, 1]} : vector<4x256xf32> to vector<1x256xf32>
    %75 = vector.broadcast %73 : vector<8x1xf32> to vector<8x256xf32>
    %76 = vector.broadcast %74 : vector<1x256xf32> to vector<8x256xf32>
    %77 = arith.mulf %75, %76 : vector<8x256xf32>
    %78 = arith.addf %71, %77 : vector<8x256xf32>
    %79 = vector.extract_strided_slice %13 {offsets = [0, 10], sizes = [8, 1], strides = [1, 1]} : vector<8x36xf32> to vector<8x1xf32>
    %80 = vector.extract_strided_slice %72 {offsets = [1, 0], sizes = [1, 256], strides = [1, 1]} : vector<4x256xf32> to vector<1x256xf32>
    %81 = vector.broadcast %79 : vector<8x1xf32> to vector<8x256xf32>
    %82 = vector.broadcast %80 : vector<1x256xf32> to vector<8x256xf32>
    %83 = arith.mulf %81, %82 : vector<8x256xf32>
    %84 = arith.addf %78, %83 : vector<8x256xf32>
    %85 = vector.extract_strided_slice %13 {offsets = [0, 19], sizes = [8, 1], strides = [1, 1]} : vector<8x36xf32> to vector<8x1xf32>
    %86 = vector.extract_strided_slice %72 {offsets = [2, 0], sizes = [1, 256], strides = [1, 1]} : vector<4x256xf32> to vector<1x256xf32>
    %87 = vector.broadcast %85 : vector<8x1xf32> to vector<8x256xf32>
    %88 = vector.broadcast %86 : vector<1x256xf32> to vector<8x256xf32>
    %89 = arith.mulf %87, %88 : vector<8x256xf32>
    %90 = arith.addf %84, %89 : vector<8x256xf32>
    %91 = vector.extract_strided_slice %13 {offsets = [0, 28], sizes = [8, 1], strides = [1, 1]} : vector<8x36xf32> to vector<8x1xf32>
    %92 = vector.extract_strided_slice %72 {offsets = [3, 0], sizes = [1, 256], strides = [1, 1]} : vector<4x256xf32> to vector<1x256xf32>
    %93 = vector.broadcast %91 : vector<8x1xf32> to vector<8x256xf32>
    %94 = vector.broadcast %92 : vector<1x256xf32> to vector<8x256xf32>
    %95 = arith.mulf %93, %94 : vector<8x256xf32>
    %96 = arith.addf %90, %95 : vector<8x256xf32>
    %c0_21 = arith.constant 0 : index
    %c113 = arith.constant 113 : index
    %97 = vector.load %arg5[%c0_21, %c113] : memref<4x512xf32, #tpu.memory_space<vmem>>, vector<4x256xf32>
    %cst_22 = arith.constant 0.000000e+00 : f32
    %98 = vector.shape_cast %41 : vector<1x256xi1> to vector<1x256xi1>
    %99 = vector.broadcast %98 : vector<1x256xi1> to vector<4x256xi1>
    %100 = vector.broadcast %cst_22 : f32 to vector<4x256xf32>
    %101 = arith.select %99, %97, %100 : vector<4x256xi1>, vector<4x256xf32>
    %102 = vector.extract_strided_slice %13 {offsets = [0, 2], sizes = [8, 1], strides = [1, 1]} : vector<8x36xf32> to vector<8x1xf32>
    %103 = vector.extract_strided_slice %101 {offsets = [0, 0], sizes = [1, 256], strides = [1, 1]} : vector<4x256xf32> to vector<1x256xf32>
    %104 = vector.broadcast %102 : vector<8x1xf32> to vector<8x256xf32>
    %105 = vector.broadcast %103 : vector<1x256xf32> to vector<8x256xf32>
    %106 = arith.mulf %104, %105 : vector<8x256xf32>
    %107 = arith.addf %96, %106 : vector<8x256xf32>
    %108 = vector.extract_strided_slice %13 {offsets = [0, 11], sizes = [8, 1], strides = [1, 1]} : vector<8x36xf32> to vector<8x1xf32>
    %109 = vector.extract_strided_slice %101 {offsets = [1, 0], sizes = [1, 256], strides = [1, 1]} : vector<4x256xf32> to vector<1x256xf32>
    %110 = vector.broadcast %108 : vector<8x1xf32> to vector<8x256xf32>
    %111 = vector.broadcast %109 : vector<1x256xf32> to vector<8x256xf32>
    %112 = arith.mulf %110, %111 : vector<8x256xf32>
    %113 = arith.addf %107, %112 : vector<8x256xf32>
    %114 = vector.extract_strided_slice %13 {offsets = [0, 20], sizes = [8, 1], strides = [1, 1]} : vector<8x36xf32> to vector<8x1xf32>
    %115 = vector.extract_strided_slice %101 {offsets = [2, 0], sizes = [1, 256], strides = [1, 1]} : vector<4x256xf32> to vector<1x256xf32>
    %116 = vector.broadcast %114 : vector<8x1xf32> to vector<8x256xf32>
    %117 = vector.broadcast %115 : vector<1x256xf32> to vector<8x256xf32>
    %118 = arith.mulf %116, %117 : vector<8x256xf32>
    %119 = arith.addf %113, %118 : vector<8x256xf32>
    %120 = vector.extract_strided_slice %13 {offsets = [0, 29], sizes = [8, 1], strides = [1, 1]} : vector<8x36xf32> to vector<8x1xf32>
    %121 = vector.extract_strided_slice %101 {offsets = [3, 0], sizes = [1, 256], strides = [1, 1]} : vector<4x256xf32> to vector<1x256xf32>
    %122 = vector.broadcast %120 : vector<8x1xf32> to vector<8x256xf32>
    %123 = vector.broadcast %121 : vector<1x256xf32> to vector<8x256xf32>
    %124 = arith.mulf %122, %123 : vector<8x256xf32>
    %125 = arith.addf %119, %124 : vector<8x256xf32>
    %c0_23 = arith.constant 0 : index
    %c127 = arith.constant 127 : index
    %126 = vector.load %arg5[%c0_23, %c127] : memref<4x512xf32, #tpu.memory_space<vmem>>, vector<4x256xf32>
    %cst_24 = arith.constant 0.000000e+00 : f32
    %127 = vector.shape_cast %39 : vector<1x256xi1> to vector<1x256xi1>
    %128 = vector.broadcast %127 : vector<1x256xi1> to vector<4x256xi1>
    %129 = vector.broadcast %cst_24 : f32 to vector<4x256xf32>
    %130 = arith.select %128, %126, %129 : vector<4x256xi1>, vector<4x256xf32>
    %131 = vector.extract_strided_slice %13 {offsets = [0, 3], sizes = [8, 1], strides = [1, 1]} : vector<8x36xf32> to vector<8x1xf32>
    %132 = vector.extract_strided_slice %130 {offsets = [0, 0], sizes = [1, 256], strides = [1, 1]} : vector<4x256xf32> to vector<1x256xf32>
    %133 = vector.broadcast %131 : vector<8x1xf32> to vector<8x256xf32>
    %134 = vector.broadcast %132 : vector<1x256xf32> to vector<8x256xf32>
    %135 = arith.mulf %133, %134 : vector<8x256xf32>
    %136 = arith.addf %125, %135 : vector<8x256xf32>
    %137 = vector.extract_strided_slice %13 {offsets = [0, 12], sizes = [8, 1], strides = [1, 1]} : vector<8x36xf32> to vector<8x1xf32>
    %138 = vector.extract_strided_slice %130 {offsets = [1, 0], sizes = [1, 256], strides = [1, 1]} : vector<4x256xf32> to vector<1x256xf32>
    %139 = vector.broadcast %137 : vector<8x1xf32> to vector<8x256xf32>
    %140 = vector.broadcast %138 : vector<1x256xf32> to vector<8x256xf32>
    %141 = arith.mulf %139, %140 : vector<8x256xf32>
    %142 = arith.addf %136, %141 : vector<8x256xf32>
    %143 = vector.extract_strided_slice %13 {offsets = [0, 21], sizes = [8, 1], strides = [1, 1]} : vector<8x36xf32> to vector<8x1xf32>
    %144 = vector.extract_strided_slice %130 {offsets = [2, 0], sizes = [1, 256], strides = [1, 1]} : vector<4x256xf32> to vector<1x256xf32>
    %145 = vector.broadcast %143 : vector<8x1xf32> to vector<8x256xf32>
    %146 = vector.broadcast %144 : vector<1x256xf32> to vector<8x256xf32>
    %147 = arith.mulf %145, %146 : vector<8x256xf32>
    %148 = arith.addf %142, %147 : vector<8x256xf32>
    %149 = vector.extract_strided_slice %13 {offsets = [0, 30], sizes = [8, 1], strides = [1, 1]} : vector<8x36xf32> to vector<8x1xf32>
    %150 = vector.extract_strided_slice %130 {offsets = [3, 0], sizes = [1, 256], strides = [1, 1]} : vector<4x256xf32> to vector<1x256xf32>
    %151 = vector.broadcast %149 : vector<8x1xf32> to vector<8x256xf32>
    %152 = vector.broadcast %150 : vector<1x256xf32> to vector<8x256xf32>
    %153 = arith.mulf %151, %152 : vector<8x256xf32>
    %154 = arith.addf %148, %153 : vector<8x256xf32>
    %c0_25 = arith.constant 0 : index
    %c128_26 = arith.constant 128 : index
    %155 = vector.load %arg5[%c0_25, %c128_26] : memref<4x512xf32, #tpu.memory_space<vmem>>, vector<4x256xf32>
    %156 = vector.extract_strided_slice %13 {offsets = [0, 4], sizes = [8, 1], strides = [1, 1]} : vector<8x36xf32> to vector<8x1xf32>
    %157 = vector.extract_strided_slice %155 {offsets = [0, 0], sizes = [1, 256], strides = [1, 1]} : vector<4x256xf32> to vector<1x256xf32>
    %158 = vector.broadcast %156 : vector<8x1xf32> to vector<8x256xf32>
    %159 = vector.broadcast %157 : vector<1x256xf32> to vector<8x256xf32>
    %160 = arith.mulf %158, %159 : vector<8x256xf32>
    %161 = arith.addf %154, %160 : vector<8x256xf32>
    %162 = vector.extract_strided_slice %13 {offsets = [0, 13], sizes = [8, 1], strides = [1, 1]} : vector<8x36xf32> to vector<8x1xf32>
    %163 = vector.extract_strided_slice %155 {offsets = [1, 0], sizes = [1, 256], strides = [1, 1]} : vector<4x256xf32> to vector<1x256xf32>
    %164 = vector.broadcast %162 : vector<8x1xf32> to vector<8x256xf32>
    %165 = vector.broadcast %163 : vector<1x256xf32> to vector<8x256xf32>
    %166 = arith.mulf %164, %165 : vector<8x256xf32>
    %167 = arith.addf %161, %166 : vector<8x256xf32>
    %168 = vector.extract_strided_slice %13 {offsets = [0, 22], sizes = [8, 1], strides = [1, 1]} : vector<8x36xf32> to vector<8x1xf32>
    %169 = vector.extract_strided_slice %155 {offsets = [2, 0], sizes = [1, 256], strides = [1, 1]} : vector<4x256xf32> to vector<1x256xf32>
    %170 = vector.broadcast %168 : vector<8x1xf32> to vector<8x256xf32>
    %171 = vector.broadcast %169 : vector<1x256xf32> to vector<8x256xf32>
    %172 = arith.mulf %170, %171 : vector<8x256xf32>
    %173 = arith.addf %167, %172 : vector<8x256xf32>
    %174 = vector.extract_strided_slice %13 {offsets = [0, 31], sizes = [8, 1], strides = [1, 1]} : vector<8x36xf32> to vector<8x1xf32>
    %175 = vector.extract_strided_slice %155 {offsets = [3, 0], sizes = [1, 256], strides = [1, 1]} : vector<4x256xf32> to vector<1x256xf32>
    %176 = vector.broadcast %174 : vector<8x1xf32> to vector<8x256xf32>
    %177 = vector.broadcast %175 : vector<1x256xf32> to vector<8x256xf32>
    %178 = arith.mulf %176, %177 : vector<8x256xf32>
    %179 = arith.addf %173, %178 : vector<8x256xf32>
    %c0_27 = arith.constant 0 : index
    %c129 = arith.constant 129 : index
    %180 = vector.load %arg5[%c0_27, %c129] : memref<4x512xf32, #tpu.memory_space<vmem>>, vector<4x256xf32>
    %cst_28 = arith.constant 0.000000e+00 : f32
    %181 = vector.shape_cast %41 : vector<1x256xi1> to vector<1x256xi1>
    %182 = vector.broadcast %181 : vector<1x256xi1> to vector<4x256xi1>
    %183 = vector.broadcast %cst_28 : f32 to vector<4x256xf32>
    %184 = arith.select %182, %180, %183 : vector<4x256xi1>, vector<4x256xf32>
    %185 = vector.extract_strided_slice %13 {offsets = [0, 5], sizes = [8, 1], strides = [1, 1]} : vector<8x36xf32> to vector<8x1xf32>
    %186 = vector.extract_strided_slice %184 {offsets = [0, 0], sizes = [1, 256], strides = [1, 1]} : vector<4x256xf32> to vector<1x256xf32>
    %187 = vector.broadcast %185 : vector<8x1xf32> to vector<8x256xf32>
    %188 = vector.broadcast %186 : vector<1x256xf32> to vector<8x256xf32>
    %189 = arith.mulf %187, %188 : vector<8x256xf32>
    %190 = arith.addf %179, %189 : vector<8x256xf32>
    %191 = vector.extract_strided_slice %13 {offsets = [0, 14], sizes = [8, 1], strides = [1, 1]} : vector<8x36xf32> to vector<8x1xf32>
    %192 = vector.extract_strided_slice %184 {offsets = [1, 0], sizes = [1, 256], strides = [1, 1]} : vector<4x256xf32> to vector<1x256xf32>
    %193 = vector.broadcast %191 : vector<8x1xf32> to vector<8x256xf32>
    %194 = vector.broadcast %192 : vector<1x256xf32> to vector<8x256xf32>
    %195 = arith.mulf %193, %194 : vector<8x256xf32>
    %196 = arith.addf %190, %195 : vector<8x256xf32>
    %197 = vector.extract_strided_slice %13 {offsets = [0, 23], sizes = [8, 1], strides = [1, 1]} : vector<8x36xf32> to vector<8x1xf32>
    %198 = vector.extract_strided_slice %184 {offsets = [2, 0], sizes = [1, 256], strides = [1, 1]} : vector<4x256xf32> to vector<1x256xf32>
    %199 = vector.broadcast %197 : vector<8x1xf32> to vector<8x256xf32>
    %200 = vector.broadcast %198 : vector<1x256xf32> to vector<8x256xf32>
    %201 = arith.mulf %199, %200 : vector<8x256xf32>
    %202 = arith.addf %196, %201 : vector<8x256xf32>
    %203 = vector.extract_strided_slice %13 {offsets = [0, 32], sizes = [8, 1], strides = [1, 1]} : vector<8x36xf32> to vector<8x1xf32>
    %204 = vector.extract_strided_slice %184 {offsets = [3, 0], sizes = [1, 256], strides = [1, 1]} : vector<4x256xf32> to vector<1x256xf32>
    %205 = vector.broadcast %203 : vector<8x1xf32> to vector<8x256xf32>
    %206 = vector.broadcast %204 : vector<1x256xf32> to vector<8x256xf32>
    %207 = arith.mulf %205, %206 : vector<8x256xf32>
    %208 = arith.addf %202, %207 : vector<8x256xf32>
    %c0_29 = arith.constant 0 : index
    %c143 = arith.constant 143 : index
    %209 = vector.load %arg5[%c0_29, %c143] : memref<4x512xf32, #tpu.memory_space<vmem>>, vector<4x256xf32>
    %cst_30 = arith.constant 0.000000e+00 : f32
    %210 = vector.shape_cast %39 : vector<1x256xi1> to vector<1x256xi1>
    %211 = vector.broadcast %210 : vector<1x256xi1> to vector<4x256xi1>
    %212 = vector.broadcast %cst_30 : f32 to vector<4x256xf32>
    %213 = arith.select %211, %209, %212 : vector<4x256xi1>, vector<4x256xf32>
    %214 = vector.extract_strided_slice %13 {offsets = [0, 6], sizes = [8, 1], strides = [1, 1]} : vector<8x36xf32> to vector<8x1xf32>
    %215 = vector.extract_strided_slice %213 {offsets = [0, 0], sizes = [1, 256], strides = [1, 1]} : vector<4x256xf32> to vector<1x256xf32>
    %216 = vector.broadcast %214 : vector<8x1xf32> to vector<8x256xf32>
    %217 = vector.broadcast %215 : vector<1x256xf32> to vector<8x256xf32>
    %218 = arith.mulf %216, %217 : vector<8x256xf32>
    %219 = arith.addf %208, %218 : vector<8x256xf32>
    %220 = vector.extract_strided_slice %13 {offsets = [0, 15], sizes = [8, 1], strides = [1, 1]} : vector<8x36xf32> to vector<8x1xf32>
    %221 = vector.extract_strided_slice %213 {offsets = [1, 0], sizes = [1, 256], strides = [1, 1]} : vector<4x256xf32> to vector<1x256xf32>
    %222 = vector.broadcast %220 : vector<8x1xf32> to vector<8x256xf32>
    %223 = vector.broadcast %221 : vector<1x256xf32> to vector<8x256xf32>
    %224 = arith.mulf %222, %223 : vector<8x256xf32>
    %225 = arith.addf %219, %224 : vector<8x256xf32>
    %226 = vector.extract_strided_slice %13 {offsets = [0, 24], sizes = [8, 1], strides = [1, 1]} : vector<8x36xf32> to vector<8x1xf32>
    %227 = vector.extract_strided_slice %213 {offsets = [2, 0], sizes = [1, 256], strides = [1, 1]} : vector<4x256xf32> to vector<1x256xf32>
    %228 = vector.broadcast %226 : vector<8x1xf32> to vector<8x256xf32>
    %229 = vector.broadcast %227 : vector<1x256xf32> to vector<8x256xf32>
    %230 = arith.mulf %228, %229 : vector<8x256xf32>
    %231 = arith.addf %225, %230 : vector<8x256xf32>
    %232 = vector.extract_strided_slice %13 {offsets = [0, 33], sizes = [8, 1], strides = [1, 1]} : vector<8x36xf32> to vector<8x1xf32>
    %233 = vector.extract_strided_slice %213 {offsets = [3, 0], sizes = [1, 256], strides = [1, 1]} : vector<4x256xf32> to vector<1x256xf32>
    %234 = vector.broadcast %232 : vector<8x1xf32> to vector<8x256xf32>
    %235 = vector.broadcast %233 : vector<1x256xf32> to vector<8x256xf32>
    %236 = arith.mulf %234, %235 : vector<8x256xf32>
    %237 = arith.addf %231, %236 : vector<8x256xf32>
    %c0_31 = arith.constant 0 : index
    %c144 = arith.constant 144 : index
    %238 = vector.load %arg5[%c0_31, %c144] : memref<4x512xf32, #tpu.memory_space<vmem>>, vector<4x256xf32>
    %239 = vector.extract_strided_slice %13 {offsets = [0, 7], sizes = [8, 1], strides = [1, 1]} : vector<8x36xf32> to vector<8x1xf32>
    %240 = vector.extract_strided_slice %238 {offsets = [0, 0], sizes = [1, 256], strides = [1, 1]} : vector<4x256xf32> to vector<1x256xf32>
    %241 = vector.broadcast %239 : vector<8x1xf32> to vector<8x256xf32>
    %242 = vector.broadcast %240 : vector<1x256xf32> to vector<8x256xf32>
    %243 = arith.mulf %241, %242 : vector<8x256xf32>
    %244 = arith.addf %237, %243 : vector<8x256xf32>
    %245 = vector.extract_strided_slice %13 {offsets = [0, 16], sizes = [8, 1], strides = [1, 1]} : vector<8x36xf32> to vector<8x1xf32>
    %246 = vector.extract_strided_slice %238 {offsets = [1, 0], sizes = [1, 256], strides = [1, 1]} : vector<4x256xf32> to vector<1x256xf32>
    %247 = vector.broadcast %245 : vector<8x1xf32> to vector<8x256xf32>
    %248 = vector.broadcast %246 : vector<1x256xf32> to vector<8x256xf32>
    %249 = arith.mulf %247, %248 : vector<8x256xf32>
    %250 = arith.addf %244, %249 : vector<8x256xf32>
    %251 = vector.extract_strided_slice %13 {offsets = [0, 25], sizes = [8, 1], strides = [1, 1]} : vector<8x36xf32> to vector<8x1xf32>
    %252 = vector.extract_strided_slice %238 {offsets = [2, 0], sizes = [1, 256], strides = [1, 1]} : vector<4x256xf32> to vector<1x256xf32>
    %253 = vector.broadcast %251 : vector<8x1xf32> to vector<8x256xf32>
    %254 = vector.broadcast %252 : vector<1x256xf32> to vector<8x256xf32>
    %255 = arith.mulf %253, %254 : vector<8x256xf32>
    %256 = arith.addf %250, %255 : vector<8x256xf32>
    %257 = vector.extract_strided_slice %13 {offsets = [0, 34], sizes = [8, 1], strides = [1, 1]} : vector<8x36xf32> to vector<8x1xf32>
    %258 = vector.extract_strided_slice %238 {offsets = [3, 0], sizes = [1, 256], strides = [1, 1]} : vector<4x256xf32> to vector<1x256xf32>
    %259 = vector.broadcast %257 : vector<8x1xf32> to vector<8x256xf32>
    %260 = vector.broadcast %258 : vector<1x256xf32> to vector<8x256xf32>
    %261 = arith.mulf %259, %260 : vector<8x256xf32>
    %262 = arith.addf %256, %261 : vector<8x256xf32>
    %c0_32 = arith.constant 0 : index
    %c145 = arith.constant 145 : index
    %263 = vector.load %arg5[%c0_32, %c145] : memref<4x512xf32, #tpu.memory_space<vmem>>, vector<4x256xf32>
    %cst_33 = arith.constant 0.000000e+00 : f32
    %264 = vector.shape_cast %41 : vector<1x256xi1> to vector<1x256xi1>
    %265 = vector.broadcast %264 : vector<1x256xi1> to vector<4x256xi1>
    %266 = vector.broadcast %cst_33 : f32 to vector<4x256xf32>
    %267 = arith.select %265, %263, %266 : vector<4x256xi1>, vector<4x256xf32>
    %268 = vector.extract_strided_slice %13 {offsets = [0, 8], sizes = [8, 1], strides = [1, 1]} : vector<8x36xf32> to vector<8x1xf32>
    %269 = vector.extract_strided_slice %267 {offsets = [0, 0], sizes = [1, 256], strides = [1, 1]} : vector<4x256xf32> to vector<1x256xf32>
    %270 = vector.broadcast %268 : vector<8x1xf32> to vector<8x256xf32>
    %271 = vector.broadcast %269 : vector<1x256xf32> to vector<8x256xf32>
    %272 = arith.mulf %270, %271 : vector<8x256xf32>
    %273 = arith.addf %262, %272 : vector<8x256xf32>
    %274 = vector.extract_strided_slice %13 {offsets = [0, 17], sizes = [8, 1], strides = [1, 1]} : vector<8x36xf32> to vector<8x1xf32>
    %275 = vector.extract_strided_slice %267 {offsets = [1, 0], sizes = [1, 256], strides = [1, 1]} : vector<4x256xf32> to vector<1x256xf32>
    %276 = vector.broadcast %274 : vector<8x1xf32> to vector<8x256xf32>
    %277 = vector.broadcast %275 : vector<1x256xf32> to vector<8x256xf32>
    %278 = arith.mulf %276, %277 : vector<8x256xf32>
    %279 = arith.addf %273, %278 : vector<8x256xf32>
    %280 = vector.extract_strided_slice %13 {offsets = [0, 26], sizes = [8, 1], strides = [1, 1]} : vector<8x36xf32> to vector<8x1xf32>
    %281 = vector.extract_strided_slice %267 {offsets = [2, 0], sizes = [1, 256], strides = [1, 1]} : vector<4x256xf32> to vector<1x256xf32>
    %282 = vector.broadcast %280 : vector<8x1xf32> to vector<8x256xf32>
    %283 = vector.broadcast %281 : vector<1x256xf32> to vector<8x256xf32>
    %284 = arith.mulf %282, %283 : vector<8x256xf32>
    %285 = arith.addf %279, %284 : vector<8x256xf32>
    %286 = vector.extract_strided_slice %13 {offsets = [0, 35], sizes = [8, 1], strides = [1, 1]} : vector<8x36xf32> to vector<8x1xf32>
    %287 = vector.extract_strided_slice %267 {offsets = [3, 0], sizes = [1, 256], strides = [1, 1]} : vector<4x256xf32> to vector<1x256xf32>
    %288 = vector.broadcast %286 : vector<8x1xf32> to vector<8x256xf32>
    %289 = vector.broadcast %287 : vector<1x256xf32> to vector<8x256xf32>
    %290 = arith.mulf %288, %289 : vector<8x256xf32>
    %291 = arith.addf %285, %290 : vector<8x256xf32>
    %c0_34 = arith.constant 0 : index
    %c0_35 = arith.constant 0 : index
    %292 = vector.load %arg3[%c0_34, %c0_35] : memref<8x1xf32, #tpu.memory_space<vmem>>, vector<8x1xf32>
    %293 = vector.broadcast %292 : vector<8x1xf32> to vector<8x256xf32>
    %294 = arith.addf %291, %293 : vector<8x256xf32>
    %c0_36 = arith.constant 0 : index
    %c0_37 = arith.constant 0 : index
    %c0_38 = arith.constant 0 : index
    %295 = vector.load %arg4[%c0_36, %c0_37, %c0_38] : memref<1x8x256xf32, #tpu.memory_space<vmem>>, vector<1x8x256xf32>
    %296 = vector.shape_cast %295 : vector<1x8x256xf32> to vector<8x256xf32>
    %297 = vector.shape_cast %294 : vector<8x256xf32> to vector<1x8x256xf32>
    tpu.vector_store %arg4[%c0_36, %c0_37, %c0_38], %297 {strides = array<i32>} : memref<1x8x256xf32, #tpu.memory_space<vmem>>, vector<1x8x256xf32>,
    return
  }
  func.func @transform_0(%arg0: i32) -> (i32, i32, i32) {
    %c0_i32 = arith.constant 0 : i32
    %c0_i32_0 = arith.constant 0 : i32
    %c0_i32_1 = arith.constant 0 : i32
    return %arg0, %c0_i32, %c0_i32_0 : i32, i32, i32
  }
  func.func @transform_1(%arg0: i32) -> (i32, i32) {
    %c0_i32 = arith.constant 0 : i32
    %c0_i32_0 = arith.constant 0 : i32
    %c0_i32_1 = arith.constant 0 : i32
    return %c0_i32, %c0_i32_0 : i32, i32
  }
  func.func @transform_2(%arg0: i32) -> (i32, i32) {
    %c0_i32 = arith.constant 0 : i32
    %c0_i32_0 = arith.constant 0 : i32
    %c0_i32_1 = arith.constant 0 : i32
    return %c0_i32, %c0_i32_0 : i32, i32
  }
  func.func @transform_3(%arg0: i32) -> (i32, i32, i32) {
    %c0_i32 = arith.constant 0 : i32
    %c0_i32_0 = arith.constant 0 : i32
    %c0_i32_1 = arith.constant 0 : i32
    return %arg0, %c0_i32, %c0_i32_0 : i32, i32, i32
  }
}

</mosaic_0001>

<bundles_post_ra>
// kernel: tpu_custom_call.1
= control target key start
LH: loop header
LB: loop body
LE: loop exit
PB: predicated region body
PF: predicated region fallthrough
CT: control target
= control target key end

     0   :  { %8 = vsyncpa [#allocation4], 0  ;;  %s2354_s0 = inlined_call_operand.hbm [shape: f32[2,4,256], index: 0, kind: input, shape index: {}]   ;;  %s2355_s1 = inlined_call_operand.vmem [shape: f32[8,36], index: 1, kind: input, shape index: {}]   ;;  %s2356_s2 = inlined_call_operand.vmem [shape: f32[8,1], index: 2, kind: input, shape index: {}]   ;;  %s2357_s3 = inlined_call_operand.hbm [shape: f32[2,8,256], index: 3, kind: output, shape index: {}]  }
   0x1   :  { %10 = vsyncpa [#allocation4 + $0x1], 0 }
   0x2   :  { %11 = vsyncpa [#allocation5], 0 }
   0x3   :  { %13 = vsyncpa [#allocation5 + $0x1], 0  ;;  %s1656_s12 = smov 0   ;;  %s1658_s13 = smov 0  }
   0x4   :  { %s1660_s14 = smov 0   ;;  %s1662_s15 = smov 0  }
   0x5 LB: > { %s1677_s16 = sadd.s32 4294967295, %s1587_s15   ;;  %s1341_s17 = sadd.s32 4294967294, %s1587_s15   ;;  %s1587_s15 = sphi %s1662_s15, %s2408_s15   ;;  %s1583_s14 = sphi %s1660_s14, %s2407_s14   ;;  %s1579_s13 = sphi %s1658_s13, %s2406_s13   ;;  %s1575_s12 = sphi %s1656_s12, %s2405_s12  }
   0x6   : > { %s1681_s18 = sadd.s32 1, %s1587_s15   ;;  %s26_s19 = sadd.s32 1, %s1583_s14 }
   0x7   : > { %s23_s20 = ssub.s32 %s1587_s15, %s1681_s18  ;;  %p33_p0 = scmp.ne.s32.totalorder %s1583_s14, %s1579_s13 }
   0x8   : > { %p24_p1 = scmp.eq.s32.totalorder %s23_s20, 0  ;;  %p34_p2 = scmp.eq.s32.totalorder %s1587_s15, 0 }
   0x9   : > { %p39_p3 = scmp.ne.s32.totalorder %s1579_s13, %s1575_s12  ;;  %p40_p4 = scmp.eq.s32.totalorder %s1677_s16, 0 }
   0xa   : > { %s1693_s21 = scalar_select %p24_p1, %s1583_s14, %s26_s19  }
   0xb   : > { %p1695_p5 = por %p34_p2, %p33_p0  ;;  %p1699_p6 = por %p40_p4, %p39_p3 }
   0xc   : > { %p105_p7 = scmp.eq.s32.totalorder %s1677_s16, 1  ;;  %p111_p8 = scmp.eq.s32.totalorder %s1341_s17, 1 }
   0xd   : > { %p1371_p10 = scmp.lt.s32.totalorder %s1587_s15, 2  ;;  %s137_s26 = sand.u32 1, %s1583_s14  }
   0xe   : > { %p1706_p11 = por %p105_p7, %p33_p0  ;;  %p1710_p12 = por %p111_p8, %p39_p3 }
   0xf   : > { %s1355_s27 = sshll.u32 %s1587_s15, 7  ;;  %s1344_s28 = sshll.u32 %s137_s26, 3 }
  0x10   : > { %s2371_s24 = scalar_select %p1706_p11, 1, 0 }
  0x11   : > { %s2372_s25 = scalar_select %p1710_p12, 1, 0 }
  0x12   : > { %s1719_s4 = scalar_lea.hbm %s2354_s0, %s1355_s27  ;;  %s141_s5 = scalar_lea.vmem [#allocation3], %s1344_s28 }
  0x13   : > { %s149_s6 = sshll.u32 %s141_s5, 4  ;;  %p1723_p13 = pnand %p1371_p10, %p1695_p5  ;;  %s1727_s6 = int_to_ptr.vmem [resolvable:$true] %s149_s6 }
  0x14   : > { %s138_s8 = scalar_lea.sflag [#allocation4], %s137_s26  ;;  %s1491_s9 = scalar_lea.hbm %s1719_s4, 128 }
  0x15   : > { %p1492_p2 = scmp.ne.s32.totalorder %s1719_s4, %s1491_s9  ;;  %p1493_p3 = pneg %p1723_p13 }
  0x16   : > { %s1496_s17 = scalar_lea.hbm %s2354_s0, 256  ;;  %p1497_p5 = scmp.lt.u32.totalorder %s1719_s4, %s2354_s0 }
  0x17   : > { %p1494_p4 = pnand %p1493_p3, %p1492_p2  ;;  %p1498_p8 = scmp.lt.u32.totalorder %s1496_s17, %s1491_s9 }
  0x18   : > { %p1500_p9 = scmp.lt.u32.totalorder %s1491_s9, %s1719_s4 }
  0x19   : > { %p1495_p7 = pneg %p1494_p4  ;;  %p1499_p10 = por %p1498_p8, %p1497_p5 }
  0x1b   : > { %p1501_p0 = por %p1500_p9, %p1499_p10 }
  0x1d   : > { %p1502_p1 = pnand %p1501_p0, %p1495_p7 }
  0x1f   : > { %1505 = shalt.err (!%p1502_p1)
}
  0x20   : > { %s1506_s22 = scalar_lea.vmem %s1727_s6, 128  ;;  %s1589_s26 = smov [#allocation3]  }
  0x21   : > { %p1507_p2 = scmp.ne.s32.totalorder %s1727_s6, %s1506_s22  ;;  %s1511_s27 = sshll.u32 %s1589_s26, 4  ;;  %s1512_s27 = int_to_ptr.vmem [resolvable:$false] %s1511_s27 }
  0x22   : > { %s1513_s28 = scalar_lea.vmem %s1512_s27, 256  ;;  %p1514_p11 = scmp.lt.s32.totalorder %s1727_s6, %s1512_s27 }
  0x23   : > { %p1509_p4 = pnand %p1507_p2, %p1493_p3  ;;  %p1515_p5 = scmp.lt.s32.totalorder %s1513_s28, %s1506_s22 }
  0x25   : > { %p1510_p12 = pneg %p1509_p4  ;;  %p1516_p8 = por %p1515_p5, %p1514_p11 }
  0x27   : > { %p1517_p9 = pnand %p1516_p8, %p1510_p12 }
  0x29   : > { %1520 = shalt.err (!%p1517_p9)
}
  0x2a   : > { %1366 = dma.hbm_to_vmem [thread:$0]  (!%p1723_p13), %s1719_s4, 128, %s1727_s6, %s138_s8  }
  0x2b   : > { %p2374_p0 = scmp.lt.s32.totalorder %s1587_s15, 3  ;;  %p2375_p1 = scmp.ge.s32.totalorder %s1587_s15, 1 }
  0x2d   : > { %p155_p3 = pnand %p2375_p1, %p2374_p0 }
  0x2f   : > { %158 = sbr.rel (%p155_p3) target bundleno = 795 (0x31b), region = 32 }
  0x36   : > { %s1761_s29 = sand.u32 1, %s1579_s13  }
  0x37   : > { %s1348_s30 = sshll.u32 %s1761_s29, 3  ;;  %s161_s5 = scalar_lea.sflag [#allocation4], %s1761_s29 }
  0x38   : > { %s164_s9 = scalar_lea.vmem [#allocation3], %s1348_s30 }
  0x39   : > { %1566 = dma.done.wait (%p1699_p6), %s161_s5, 128  }
  0x3a   : > { %1568 = vsyncadd (%p1699_p6), %s161_s5, 4294967168  ;;  %vm188_vm0 = vcmask 293888   ;;  %v1772_v0 = vld [vmem:[%s2355_s1] sm:$0xff]  ;;  %vm192_vm1 = vcmask 7168   ;;  %v1779_v4 = vld [vmem:[%s164_s9] sm:$0xff]  ;;  %v1590_v5 = vmov 0.0   ;;  %v215_v23 = vlaneseq }
  0x3b   : > { %v189_v1 = vsel %vm188_vm0, %v1772_v0, 0.0  ;;  %211 = vst [vmem:[#allocation2] sm:$0xf] %v1590_v5  ;;  %214 = vst [vmem:[#allocation2 + $0x4] sm:$0xff] %v1779_v4  ;;  %s1591_s23 = smov 17   ;;  %s1592_s7 = smov 15   ;;  %v1794_v11 = vcombine.high %v1779_v4, %v1779_v4 }
  0x3c   : > { %190 = vadd.xlane.f32.xlu0 %v189_v1  ;;  %212 = vst [vmem:[#allocation2 + $0xc] sm:$0xf] %v1590_v5  ;;  %s1593_s8 = smov 1   ;;  %s1594_s10 = smov 127   ;;  %v1596_v13 = vmov 10   ;;  %v1597_v14 = vmov 0  }
  0x3d   : > { %s1595_s11 = smov 113   ;;  %1455 = vset.pattern.permute.xlu0 %v1596_v13  ;;  %1450 = vset.pattern.permute.xlu1 %v1597_v14  ;;  %v216_v24 = vand.u32 127, %v215_v23  ;;  %vm261_vm2 = vcmask 138240   ;;  %v2380_v37 = vmov 0  ;;  %vm545_vm6 = vcmask 121856   ;;  %s1628_s20 = smov 16  }
  0x3e   : > { %v2383_v42 = vmov 0  ;;  %vm814_vm8 = vcmask 1039360   ;;  %v1598_v1 = vmov 28   ;;  %v1601_v5 = vmov 18   ;;  %s1629_s22 = smov 111   ;;  %s1631_s26 = smov 112  }
  0x3f   : > { %v222_v25 = vand.u32 15, %v216_v24  ;;  %v217_v27 = vadd.s32 128, %v216_v24  ;;  %v1607_v13 = vmov 19   ;;  %v1616_v24 = vmov 25   ;;  %s1349_s30 = sshll.u32 %s1761_s29, 4  ;;  %s1356_s5 = sshll.u32 %s1677_s16, 8 }
  0x40   : > { %vm896_vm9 = vcmask 924672   ;;  %vm380_vm10 = vcmask 130048   ;;  %vm1175_vm11 = vcmask 908288   ;;  %vm1014_vm12 = vcmask 916480   ;;  %s186_s9 = scalar_lea.vmem [#allocation6], %s1349_s30  ;;  %p2402_p11 = scmp.ne.s32.totalorder %s2371_s24, 0 }
  0x41   : > { %vm1804_vm3 = vcmp.ge.s32.totalorder %v222_v25, 1  ;;  %v229_v32 = vand.u32 15, %v217_v27  ;;  %vm1820_vm5 = vcmp.lt.s32.totalorder %v222_v25, 15  ;;  %v1617_v25 = vmov 3   ;;  %s1271_s4 = sshll.u32 %s186_s9, 4  ;;  %s2312_s4 = int_to_ptr.vmem [resolvable:$true] %s1271_s4 }
  0x42   : > { %v1782_v6 = vld [vmem:[#allocation2] sm:$0xff]  ;;  %v247_v7 = vld [vmem:[#allocation2 + $0x8] sm:$0xf]  ;;  %v2381_v37 = vsel %vm1820_vm5, 4294967295, %v2380_v37  ;;  %v1619_v27 = vmov 30   ;;  %s1521_s16 = scalar_lea.vmem %s2312_s4, 256 }
  0x43   : > { %255 = vrot.lane.b32.xlu1 %v1782_v6, %s1591_s23  ;;  %v254_v8 = vcombine.high %v1782_v6, %v1782_v6  ;;  %v1788_v9 = vld [vmem:[#allocation2 + $0x8] sm:$0xf]  ;;  %v804_v12 = vld [vmem:[#allocation2 + $0xc] sm:$0xf]  ;;  %vm1812_vm4 = vcmp.ge.s32.totalorder %v229_v32, 1  ;;  %2382 = vst [vmem:[#allocation9_spill] sm:$0xff] %v2381_v37  ;;  %p1522_p6 = scmp.ne.s32.totalorder %s2312_s4, %s1521_s16 }
  0x44   : > { %v617_v10 = vld [vmem:[#allocation2 + $0x8] sm:$0xf]  ;;  %vm1828_vm7 = vcmp.lt.s32.totalorder %v229_v32, 15  ;;  %v1623_v32 = vmov 14  }
  0x45   : > { %v2384_v42 = vsel %vm1828_vm7, 4294967295, %v2383_v42  ;;  %p1523_p12 = pnand %p1522_p6, %p2402_p11 }
  0x46   : > { %2385 = vst [vmem:[#allocation10_spill] sm:$0xff] %v2384_v42 }
  0x47   : > { %257 = vrot.lane.b32.xlu1 %v254_v8, %s1591_s23  ;;  %p1524_p13 = pneg %p1523_p12 }
  0x4b   : > { %541 = vrot.lane.b32.xlu1 %v254_v8, %s1592_s7 }
  0x4f   : > { %623 = vrot.lane.b32.xlu1 %v254_v8, %s1593_s8  ;;  %v1604_v8 = vmov 34  }
  0x53   : > { %625 = vrot.lane.b32.xlu1 %v617_v10, %s1593_s8  ;;  %v1605_v10 = vmov 1  }
  0x57   : > { %810 = vrot.lane.b32.xlu1 %v1794_v11, %s1594_s10 }
  0x5b   : > { %892 = vrot.lane.b32.xlu1 %v1794_v11, %s1595_s11 }
  0xb5   : > { %v256_v22 = vpop.permute.xlu1 %255 }
  0xb9   : > { %v258_v26 = vpop.permute.xlu1 %257 }
  0xba   : > { %v262_v29 = vsel %vm261_vm2, %v256_v22, %v258_v26  ;;  %v1615_v22 = vmov 33  }
  0xbb   : > { %v1810_v33 = vsel %vm1804_vm3, %v262_v29, 0.0  ;;  %v1621_v29 = vmov 22  }
  0xbd   : > { %v542_v35 = vpop.permute.xlu1 %541 }
  0xc1   : > { %v624_v41 = vpop.permute.xlu1 %623 }
  0xc5   : > { %v626_v46 = vpop.permute.xlu1 %625 }
  0xc6   : > { %v628_v47 = vsel %vm192_vm1, %v624_v41, %v626_v46 }
  0xc7   : > { %v1839_v49 = vsel %vm1812_vm4, %v628_v47, 0.0 }
  0xc9   : > { %v1775_v2 = vpop.xlane.xlu0 %190  ;;  %v811_v52 = vpop.permute.xlu1 %810 }
  0xca   : > { %v193_v3 = vsel %vm192_vm1, %v1775_v2, 0.0  ;;  %1489 = vrcp.f32 %v1775_v2  ;;  %v1600_v2 = vmov 11  }
  0xcb   : > { %194 = vadd.xlane.f32.xlu0 %v193_v3  ;;  %v1599_v3 = vmov 9  }
  0xcd   : > { %v1894_v46 = vpop.permute.xlu1 %892 }
  0xd4   : > { %v1490_v59 = vpop.eup %1489 }
  0xe1   : > { %259 = vrot.lane.b32.xlu0 %v247_v7, %s1591_s23  ;;  %v1603_v7 = vmov 27  }
  0xe5   : > { %539 = vrot.lane.b32.xlu0 %v1782_v6, %s1592_s7 }
  0xe9   : > { %543 = vrot.lane.b32.xlu0 %v1788_v9, %s1592_s7  ;;  %s2310_s7 = scalar_lea.hbm %s2357_s3, %s1356_s5 }
  0xed   : > { %621 = vrot.lane.b32.xlu0 %v1782_v6, %s1593_s8  ;;  %s1257_s8 = scalar_lea.sflag [#allocation5], %s1761_s29 }
  0xf1   : > { %808 = vrot.lane.b32.xlu0 %v1779_v4, %s1594_s10 }
  0xf5   : > { %812 = vrot.lane.b32.xlu0 %v804_v12, %s1594_s10  ;;  %v1606_v12 = vmov 12   ;;  %s1635_s10 = smov [#allocation6]  }
  0xf9   : > { %890 = vrot.lane.b32.xlu0 %v1779_v4, %s1595_s11 }
 0x158   : > { %v195_v15 = vpop.xlane.xlu0 %194 }
 0x159   : > { %v196_v16 = vrot.slane %v195_v15, 4 }
 0x15b   : > { %v197_v17 = vadd.f32 %v196_v16, %v195_v15  ;;  %v1608_v15 = vmov 4   ;;  %v1609_v16 = vmov 2  }
 0x15c   : > { %v260_v28 = vpop.permute.xlu0 %259 }
 0x15d   : > { %v198_v18 = vrot.slane %v197_v17, 2  ;;  %v263_v30 = vsel %vm261_vm2, %v258_v26, %v260_v28  ;;  %v1618_v26 = vmov 21   ;;  %v1620_v28 = vmov 13  }
 0x15e   : > { %v1818_v36 = vsel %vm1812_vm4, %v263_v30, 0.0  ;;  %v1622_v30 = vmov 5  }
 0x15f   : > { %v199_v19 = vadd.f32 %v198_v18, %v197_v17  ;;  %v1610_v17 = vmov 31   ;;  %v1611_v18 = vmov 20  }
 0x160   : > { %v540_v38 = vpop.permute.xlu0 %539 }
 0x161   : > { %v200_v20 = vrot.slane %v199_v19, 1  ;;  %v546_v39 = vsel %vm545_vm6, %v540_v38, %v542_v35  ;;  %v1625_v38 = vmov 6  }
 0x162   : > { %v1826_v40 = vsel %vm1820_vm5, %v546_v39, 0.0  ;;  %v1626_v39 = vmov 15  }
 0x163   : > { %v201_v21 = vadd.f32 %v200_v20, %v199_v19  ;;  %v1612_v19 = vmov 32   ;;  %v1613_v20 = vmov 29  }
 0x164   : > { %v544_v43 = vpop.permute.xlu0 %543 }
 0x165   : > { %1357 = vpush %v201_v21  ;;  %v547_v44 = vsel %vm545_vm6, %v542_v35, %v544_v43  ;;  %v1614_v21 = vmov 16   ;;  %v1624_v35 = vmov 23   ;;  %v1889_v43 = vshrl.u32 %v215_v23, 7 }
 0x166   : > { %v1834_v45 = vsel %vm1828_vm7, %v547_v44, 0.0 }
 0x167   : > { %v1892_v44 = vsub.s32 0, %v1889_v43 }
 0x168   : > { %v622_v48 = vpop.permute.xlu0 %621 }
 0x169   : > { %v627_v50 = vsel %vm192_vm1, %v622_v48, %v624_v41  ;;  %v1627_v41 = vmov 24   ;;  %2386 = vst [vmem:[#allocation11_spill] sm:$0xff] %v1892_v44  ;;  %v276_v48 = vrot.slane %v1810_v33, %v1892_v44 }
 0x16a   : > { %v1844_v51 = vsel %vm1804_vm3, %v627_v50, 0.0  ;;  %v280_v50 = vrot.slane %v1818_v36, %v1892_v44 }
 0x16c   : > { %v809_v53 = vpop.permute.xlu0 %808 }
 0x16d   : > { %v815_v54 = vsel %vm814_vm8, %v809_v53, %v811_v52  ;;  %v1903_v53 = vsub.s32 1, %v1889_v43 }
 0x16e   : > { %v1848_v55 = vsel %vm1820_vm5, %v815_v54, 0.0 }
 0x170   : > { %v813_v56 = vpop.permute.xlu0 %812 }
 0x171   : > { %v816_v57 = vsel %vm814_vm8, %v811_v52, %v813_v56 }
 0x172   : > { %v1852_v58 = vsel %vm1828_vm7, %v816_v57, 0.0  ;;  %v292_v57 = vrot.slane %v1810_v33, %v1903_v53 }
 0x174   : > { %v1896_v47 = vpop.permute.xlu0 %890 }
 0x196   : > { %s1358_s17 = spop %1357 }
 0x197   : > { %s205_s19 = smul.f32 0.125, %s1358_s17 }
 0x199   : > { %v206_v60 = vstv %s205_s19 }
 0x19a   : > { %v208_v61 = vmul.f32 %v1490_v59, %v206_v60  ;;  %v296_v59 = vrot.slane %v1818_v36, %v1903_v53  ;;  %v1912_v60 = vsub.s32 2, %v1889_v43 }
 0x19c   : > { %v209_v62 = vmin.f32 %v208_v61, 1.0  ;;  %2387 = vst [vmem:[#allocation12_spill] sm:$0xff] %v1912_v60 }
 0x19e   : > { %v1856_v63 = vmul.f32 %v209_v62, %v1772_v0  ;;  %v1602_v0 = vmov 7  }
 0x1a0   : > { %388 = vperm.xlu0 %1455, %v1856_v63   ;;  %270 = vperm.xlu1 %1450, %v1856_v63  }
 0x1a4   : > { %1457 = vset.pattern.permute.xlu0 %v1598_v1  ;;  %1451 = vset.pattern.permute.xlu1 %v1599_v3 }
 0x1a5   : > { %486 = vperm.xlu0 %1457, %v1856_v63   ;;  %286 = vperm.xlu1 %1451, %v1856_v63  }
 0x1a9   : > { %1459 = vset.pattern.permute.xlu0 %v1600_v2  ;;  %1452 = vset.pattern.permute.xlu1 %v1601_v5 }
 0x1aa   : > { %569 = vperm.xlu0 %1459, %v1856_v63   ;;  %302 = vperm.xlu1 %1452, %v1856_v63  }
 0x1ae   : > { %1462 = vset.pattern.permute.xlu0 %v1602_v0  ;;  %1453 = vset.pattern.permute.xlu1 %v1603_v7  ;;  %v308_v0 = vrot.slane %v1810_v33, %v1912_v60  ;;  %v312_v7 = vrot.slane %v1818_v36, %v1912_v60 }
 0x1af   : > { %970 = vperm.xlu0 %1462, %v1856_v63   ;;  %318 = vperm.xlu1 %1453, %v1856_v63  }
 0x1b3   : > { %1465 = vset.pattern.permute.xlu0 %v1604_v8  ;;  %1454 = vset.pattern.permute.xlu1 %v1605_v10  ;;  %v575_v8 = vrot.slane %v1826_v40, %v1903_v53  ;;  %v579_v10 = vrot.slane %v1834_v45, %v1903_v53 }
 0x1b4   : > { %1120 = vperm.xlu0 %1465, %v1856_v63   ;;  %336 = vperm.xlu1 %1454, %v1856_v63  }
 0x1b8   : > { %1467 = vset.pattern.permute.xlu0 %v1606_v12  ;;  %1456 = vset.pattern.permute.xlu1 %v1607_v13  ;;  %v1925_v12 = vsub.s32 3, %v1889_v43 }
 0x1b9   : > { %650 = vperm.xlu0 %1467, %v1856_v63   ;;  %437 = vperm.xlu1 %1456, %v1856_v63  }
 0x1bd   : > { %1470 = vset.pattern.permute.xlu0 %v1608_v15  ;;  %1458 = vset.pattern.permute.xlu1 %v1609_v16  ;;  %v347_v16 = vsub.s32 4, %v1889_v43 }
 0x1be   : > { %699 = vperm.xlu0 %1470, %v1856_v63   ;;  %553 = vperm.xlu1 %1458, %v1856_v63  }
 0x1c2   : > { %1473 = vset.pattern.permute.xlu0 %v1610_v17  ;;  %1460 = vset.pattern.permute.xlu1 %v1611_v18 }
 0x1c3   : > { %778 = vperm.xlu0 %1473, %v1856_v63   ;;  %585 = vperm.xlu1 %1460, %v1856_v63  }
 0x1c7   : > { %1477 = vset.pattern.permute.xlu0 %v1612_v19  ;;  %1461 = vset.pattern.permute.xlu1 %v1613_v20 }
 0x1c8   : > { %870 = vperm.xlu0 %1477, %v1856_v63   ;;  %601 = vperm.xlu1 %1461, %v1856_v63  }
 0x1cc   : > { %1463 = vset.pattern.permute.xlu1 %v1614_v21  ;;  %1481 = vset.pattern.permute.xlu0 %v1615_v22 }
 0x1cd   : > { %1022 = vperm.xlu1 %1463, %v1856_v63  }
 0x1d1   : > { %1464 = vset.pattern.permute.xlu1 %v1616_v24  ;;  %v344_v24 = vrot.slane %v1782_v6, %v1892_v44 }
 0x1d2   : > { %1071 = vperm.xlu1 %1464, %v1856_v63  }
 0x1d6   : > { %1466 = vset.pattern.permute.xlu1 %v1617_v25  ;;  %v348_v25 = vrot.slane %v1782_v6, %v347_v16 }
 0x1d7   : > { %634 = vperm.xlu1 %1466, %v1856_v63  }
 0x1db   : > { %1468 = vset.pattern.permute.xlu1 %v1618_v26  ;;  %v324_v26 = vrot.slane %v1810_v33, %v1925_v12 }
 0x1dc   : > { %666 = vperm.xlu1 %1468, %v1856_v63  }
 0x1e0   : > { %1469 = vset.pattern.permute.xlu1 %v1619_v27  ;;  %v328_v27 = vrot.slane %v1818_v36, %v1925_v12  ;;  %v495_v36 = vsub.s32 7, %v1889_v43 }
 0x1e1   : > { %682 = vperm.xlu1 %1469, %v1856_v63  }
 0x1e5   : > { %1471 = vset.pattern.permute.xlu1 %v1620_v28 }
 0x1e6   : > { %726 = vperm.xlu1 %1471, %v1856_v63  }
 0x1ea   : > { %1472 = vset.pattern.permute.xlu1 %v1621_v29  ;;  %v402_v29 = vrot.slane %v1788_v9, %v1903_v53 }
 0x1eb   : > { %752 = vperm.xlu1 %1472, %v1856_v63  }
 0x1ec   : > { %v417_v33 = vrot.slane %v402_v29, %v1903_v53  ;;  %v591_v29 = vrot.slane %v1826_v40, %v1912_v60 }
 0x1ef   : > { %1474 = vset.pattern.permute.xlu1 %v1622_v30 }
 0x1f0   : > { %822 = vperm.xlu1 %1474, %v1856_v63  }
 0x1f4   : > { %1475 = vset.pattern.permute.xlu1 %v1623_v32 }
 0x1f5   : > { %838 = vperm.xlu1 %1475, %v1856_v63  }
 0x1f9   : > { %1476 = vset.pattern.permute.xlu1 %v1624_v35  ;;  %v352_v35 = vrot.slane %v1788_v9, %v1892_v44 }
 0x1fa   : > { %854 = vperm.xlu1 %1476, %v1856_v63  }
 0x1fe   : > { %1478 = vset.pattern.permute.xlu1 %v1625_v38  ;;  %v359_v38 = vrot.slane %v344_v24, %v1892_v44  ;;  %v446_v24 = vsub.s32 6, %v1889_v43 }
 0x1ff   : > { %904 = vperm.xlu1 %1478, %v1856_v63  }
 0x203   : > { %1479 = vset.pattern.permute.xlu1 %v1626_v39  ;;  %v363_v39 = vrot.slane %v348_v25, %v1892_v44 }
 0x204   : > { %920 = vperm.xlu1 %1479, %v1856_v63  }
 0x208   : > { %1480 = vset.pattern.permute.xlu1 %v1627_v41 }
 0x21f   : > { %v271_v52 = vpop.permute.xlu1 %270  ;;  %v1905_v54 = vpop.permute.xlu0 %388 }
 0x220   : > { %v281_v23 = vmul.f32 %v276_v48, %v271_v52  ;;  %v282_v56 = vmul.f32 %v280_v50, %v271_v52  ;;  %v367_v52 = vrot.slane %v352_v35, %v1892_v44 }
 0x224   : > { %v287_v61 = vpop.permute.xlu1 %286  ;;  %v1914_v62 = vpop.permute.xlu0 %486 }
 0x225   : > { %v297_v1 = vmul.f32 %v292_v57, %v287_v61  ;;  %v298_v3 = vmul.f32 %v296_v59, %v287_v61  ;;  %v451_v57 = vrot.slane %v1788_v9, %v1912_v60  ;;  %v394_v59 = vrot.slane %v1782_v6, %v1903_v53 }
 0x226   : > { %v397_v61 = vsub.s32 5, %v1889_v43 }
 0x227   : > { %v299_v2 = vadd.f32 %v297_v1, %v281_v23  ;;  %v300_v5 = vadd.f32 %v298_v3, %v282_v56  ;;  %v420_v1 = vmul.f32 %v417_v33, %v1905_v54  ;;  %v496_v3 = vrot.slane %v1782_v6, %v495_v36 }
 0x229   : > { %v303_v13 = vpop.permute.xlu1 %302  ;;  %v570_v15 = vpop.permute.xlu0 %569 }
 0x22a   : > { %v313_v17 = vmul.f32 %v308_v0, %v303_v13  ;;  %v314_v18 = vmul.f32 %v312_v7, %v303_v13  ;;  %v1928_v19 = vmul.f32 %v575_v8, %v570_v15  ;;  %v1930_v20 = vmul.f32 %v579_v10, %v570_v15 }
 0x22b   : > { %v398_v7 = vrot.slane %v1782_v6, %v397_v61  ;;  %v409_v8 = vrot.slane %v394_v59, %v1903_v53  ;;  %v511_v10 = vrot.slane %v496_v3, %v1925_v12  ;;  %v559_v15 = vrot.slane %v1826_v40, %v1892_v44 }
 0x22c   : > { %v315_v21 = vadd.f32 %v313_v17, %v299_v2  ;;  %v316_v22 = vadd.f32 %v314_v18, %v300_v5  ;;  %v466_v5 = vrot.slane %v451_v57, %v1912_v60  ;;  %v563_v17 = vrot.slane %v1834_v45, %v1892_v44 }
 0x22d   : > { %v413_v18 = vrot.slane %v398_v7, %v1903_v53  ;;  %v607_v57 = vrot.slane %v1826_v40, %v1925_v12  ;;  %v611_v59 = vrot.slane %v1834_v45, %v1925_v12 }
 0x22e   : > { %v319_v28 = vpop.permute.xlu1 %318 }
 0x22f   : > { %v329_v30 = vmul.f32 %v324_v26, %v319_v28  ;;  %v330_v32 = vmul.f32 %v328_v27, %v319_v28  ;;  %v517_v28 = vmul.f32 %v511_v10, %v1914_v62  ;;  %v2026_v10 = vld [vmem:[#allocation2 + $0xc] sm:$0xf] }
 0x231   : > { %v1947_v41 = vadd.f32 %v329_v30, %v315_v21  ;;  %v1949_v48 = vadd.f32 %v330_v32, %v316_v22  ;;  %v418_v21 = vmul.f32 %v409_v8, %v1905_v54  ;;  %v443_v22 = vrot.slane %v1782_v6, %v1912_v60 }
 0x232   : > { %v419_v30 = vmul.f32 %v413_v18, %v1905_v54  ;;  %v447_v32 = vrot.slane %v1782_v6, %v446_v24  ;;  %v492_v54 = vrot.slane %v1782_v6, %v1925_v12  ;;  %v500_v6 = vrot.slane %v1788_v9, %v1925_v12 }
 0x233   : > { %v337_v50 = vpop.permute.xlu1 %336  ;;  %v458_v35 = vrot.slane %v443_v22, %v1912_v60  ;;  %v1630_v9 = vmov 26   ;;  %v1028_v18 = vrot.slane %v1779_v4, %v1903_v53  ;;  %v644_v22 = vrot.slane %v1839_v49, %v1892_v44 }
 0x234   : > { %v368_v23 = vmul.f32 %v359_v38, %v337_v50  ;;  %v369_v56 = vmul.f32 %v363_v39, %v337_v50  ;;  %v370_v2 = vmul.f32 %v367_v52, %v337_v50  ;;  %v595_v38 = vrot.slane %v1834_v45, %v1912_v60  ;;  %v886_v52 = vld [vmem:[#allocation2 + $0xc] sm:$0xf] }
 0x235   : > { %v515_v45 = vrot.slane %v500_v6, %v1925_v12  ;;  %v978_v6 = vrot.slane %v1779_v4, %v1892_v44 }
 0x236   : > { %376 = vrot.lane.b32.xlu0 %v369_v56, %s1628_s20  ;;  %374 = vrot.lane.b32.xlu1 %v368_v23, %s1628_s20  ;;  %v462_v23 = vrot.slane %v447_v32, %v1912_v60 }
 0x238   : > { %v438_v0 = vpop.permute.xlu1 %437 }
 0x239   : > { %v469_v13 = vmul.f32 %v466_v5, %v438_v0  ;;  %v467_v56 = vmul.f32 %v458_v35, %v438_v0  ;;  %v507_v5 = vrot.slane %v492_v54, %v1925_v12  ;;  %v468_v7 = vmul.f32 %v462_v23, %v438_v0 }
 0x23a   : > { %378 = vrot.lane.b32.xlu1 %v370_v2, %s1628_s20  ;;  %428 = vrot.lane.b32.xlu0 %v420_v1, %s1628_s20  ;;  %v986_v0 = vrot.slane %v2026_v10, %v1892_v44  ;;  %v1043_v35 = vrot.slane %v1028_v18, %v1903_v53  ;;  %v1632_v54 = vmov 8   ;;  %v982_v18 = vrot.slane %v1779_v4, %v347_v16 }
 0x23b   : > { %v516_v8 = vmul.f32 %v507_v5, %v1914_v62  ;;  %v688_v5 = vrot.slane %v1844_v51, %v1925_v12 }
 0x23d   : > { %v554_v25 = vpop.permute.xlu1 %553 }
 0x23e   : > { %v1982_v26 = vmul.f32 %v559_v15, %v554_v25  ;;  %v1984_v27 = vmul.f32 %v563_v17, %v554_v25  ;;  %477 = vrot.lane.b32.xlu0 %v469_v13, %s1628_s20  ;;  %424 = vrot.lane.b32.xlu1 %v418_v21, %s1628_s20  ;;  %v518_v13 = vmul.f32 %v515_v45, %v1914_v62  ;;  %v971_v21 = vpop.permute.xlu0 %970 }
 0x23f   : > { %v1001_v17 = vrot.slane %v986_v0, %v1892_v44  ;;  %v640_v25 = vrot.slane %v1844_v51, %v1892_v44 }
 0x241   : > { %v1004_v32 = vmul.f32 %v1001_v17, %v971_v21 }
 0x242   : > { %v586_v39 = vpop.permute.xlu1 %585  ;;  %524 = vrot.lane.b32.xlu0 %v517_v28, %s1628_s20  ;;  %426 = vrot.lane.b32.xlu1 %v419_v30, %s1628_s20  ;;  %v1036_v28 = vrot.slane %v2026_v10, %v1903_v53 }
 0x243   : > { %v1999_v33 = vmul.f32 %v591_v29, %v586_v39  ;;  %v2001_v50 = vmul.f32 %v595_v38, %v586_v39  ;;  %v676_v38 = vrot.slane %v1839_v49, %v1912_v60  ;;  %v672_v39 = vrot.slane %v1844_v51, %v1912_v60 }
 0x246   : > { %894 = vrot.lane.b32.xlu0 %v886_v52, %s1595_s11  ;;  %473 = vrot.lane.b32.xlu1 %v467_v56, %s1628_s20  ;;  %v1051_v52 = vrot.slane %v1036_v28, %v1903_v53  ;;  %v1121_v28 = vpop.permute.xlu0 %1120  ;;  %s1525_s11 = sshll.u32 %s1635_s10, 4  ;;  %s1526_s11 = int_to_ptr.vmem [resolvable:$false] %s1525_s11 }
 0x247   : > { %v602_v1 = vpop.permute.xlu1 %601  ;;  %s1527_s17 = scalar_lea.vmem %s1526_s11, 512  ;;  %p1528_p7 = scmp.lt.s32.totalorder %s2312_s4, %s1526_s11 }
 0x248   : > { %v2013_v3 = vmul.f32 %v607_v57, %v602_v1  ;;  %v2015_v2 = vmul.f32 %v611_v59, %v602_v1  ;;  %v1081_v57 = vrot.slane %v1779_v4, %v446_v24  ;;  %v1134_v24 = vrot.slane %v2026_v10, %v1925_v12  ;;  %p1529_p10 = scmp.lt.s32.totalorder %s1527_s17, %s1521_s16 }
 0x24a   : > { %952 = vperm.xlu0 %1481, %v1856_v63   ;;  %475 = vrot.lane.b32.xlu1 %v468_v7, %s1628_s20  ;;  %v1032_v7 = vrot.slane %v1779_v4, %v397_v61  ;;  %v2095_v61 = vrot.slane %v978_v6, %v1892_v44  ;;  %p1530_p2 = por %p1529_p10, %p1528_p7 }
 0x24c   : > { %v2022_v40 = vpop.permute.xlu1 %1022  ;;  %p1531_p4 = pnand %p1530_p2, %p1524_p13 }
 0x24d   : > { %v1052_v56 = vmul.f32 %v1043_v35, %v2022_v40  ;;  %v1054_v45 = vmul.f32 %v1051_v52, %v2022_v40  ;;  %v1634_v52 = vmov 35  }
 0x24e   : > { %1169 = vrot.lane.b32.xlu0 %v1779_v4, %s1629_s22  ;;  %522 = vrot.lane.b32.xlu1 %v516_v8, %s1628_s20  ;;  %v1096_v8 = vrot.slane %v1081_v57, %v1912_v60 }
 0x24f   : > { %1484 = vset.pattern.permute.xlu0 %v1630_v9  ;;  %v1633_v9 = vmov 17  }
 0x251   : > { %v2034_v15 = vpop.permute.xlu1 %1071 }
 0x252   : > { %1173 = vrot.lane.b32.xlu0 %v2026_v10, %s1629_s22  ;;  %526 = vrot.lane.b32.xlu1 %v518_v13, %s1628_s20 }
 0x256   : > { %v635_v62 = vpop.permute.xlu1 %634  ;;  %1215 = vperm.xlu0 %1484, %v1856_v63   ;;  %936 = vperm.xlu1 %1480, %v1856_v63  }
 0x257   : > { %v2049_v29 = vmul.f32 %v640_v25, %v635_v62  ;;  %v2051_v30 = vmul.f32 %v644_v22, %v635_v62  ;;  %v1149_v22 = vrot.slane %v1134_v24, %v1925_v12  ;;  %v1047_v25 = vrot.slane %v1032_v7, %v1903_v53 }
 0x258   : > { %v1102_v62 = vmul.f32 %v1096_v8, %v2034_v15  ;;  %v828_v24 = vrot.slane %v1848_v55, %v1892_v44  ;;  %v832_v7 = vrot.slane %v1852_v58, %v1892_v44 }
 0x25a   : > { %1012 = vrot.lane.b32.xlu0 %v1004_v32, %s1631_s26  ;;  %1482 = vset.pattern.permute.xlu1 %v1632_v54  ;;  %v1077_v32 = vrot.slane %v1779_v4, %v1912_v60  ;;  %v2110_v54 = vrot.slane %v982_v18, %v1892_v44  ;;  %v844_v18 = vrot.slane %v1848_v55, %v1903_v53 }
 0x25b   : > { %v667_v23 = vpop.permute.xlu1 %666  ;;  %1486 = vset.pattern.permute.xlu0 %v1597_v14  ;;  %1183 = vperm.xlu1 %1482, %v1856_v63   ;;  %v692_v14 = vrot.slane %v1839_v49, %v1925_v12 }
 0x25c   : > { %v2066_v59 = vmul.f32 %v672_v39, %v667_v23  ;;  %v2068_v1 = vmul.f32 %v676_v38, %v667_v23  ;;  %v1002_v23 = vmul.f32 %v2095_v61, %v971_v21  ;;  %v1092_v57 = vrot.slane %v1077_v32, %v1912_v60 }
 0x25e   : > { %1058 = vrot.lane.b32.xlu0 %v1052_v56, %s1631_s26  ;;  %v1152_v56 = vmul.f32 %v1149_v22, %v1121_v28  ;;  %v1126_v22 = vrot.slane %v1779_v4, %v1925_v12 }
 0x25f   : > { %1483 = vset.pattern.permute.xlu1 %v1633_v9 }
 0x260   : > { %v683_v0 = vpop.permute.xlu1 %682  ;;  %1199 = vperm.xlu1 %1483, %v1856_v63  }
 0x261   : > { %v2085_v13 = vmul.f32 %v688_v5, %v683_v0  ;;  %v2087_v17 = vmul.f32 %v692_v14, %v683_v0  ;;  %v1246_v5 = vld [vmem:[%s2356_s2] sm:$0xff] }
 0x262   : > { %1062 = vrot.lane.b32.xlu0 %v1054_v45, %s1631_s26  ;;  %v1053_v45 = vmul.f32 %v1047_v25, %v2022_v40  ;;  %v1101_v40 = vmul.f32 %v1092_v57, %v2034_v15 }
 0x264   : > { %1171 = vrot.lane.b32.xlu1 %v1794_v11, %s1629_s22 }
 0x265   : > { %v727_v38 = vpop.permute.xlu1 %726  ;;  %1485 = vset.pattern.permute.xlu1 %v1634_v52  ;;  %v897_v52 = vsel %vm896_vm9, %v1896_v47, %v1894_v46 }
 0x266   : > { %v2104_v39 = vmul.f32 %v1043_v35, %v727_v38  ;;  %v2106_v16 = vmul.f32 %v1047_v25, %v727_v38  ;;  %1109 = vrot.lane.b32.xlu0 %v1102_v62, %s1631_s26  ;;  %v1003_v35 = vmul.f32 %v2110_v54, %v971_v21  ;;  %v1085_v21 = vrot.slane %v2026_v10, %v1912_v60 }
 0x267   : > { %v848_v10 = vrot.slane %v1852_v58, %v1903_v53  ;;  %v2167_v47 = vsel %vm1804_vm3, %v897_v52, 0.0 }
 0x268   : > { %1008 = vrot.lane.b32.xlu1 %v1002_v23, %s1631_s26  ;;  %v1100_v62 = vrot.slane %v1085_v21, %v1912_v60  ;;  %v1130_v23 = vrot.slane %v1779_v4, %v495_v36  ;;  %2388 = vst [vmem:[#allocation13_spill] sm:$0xff] %v2167_v47  ;;  %v926_v21 = vrot.slane %v2167_v47, %v1903_v53 }
 0x26a   : > { %v753_v11 = vpop.permute.xlu1 %752  ;;  %1160 = vrot.lane.b32.xlu0 %v1152_v56, %s1631_s26  ;;  %v2157_v56 = vrot.slane %v1126_v22, %v1925_v12  ;;  %v2174_v36 = vrot.slane %v1130_v23, %v1925_v12  ;;  %v651_v22 = vpop.permute.xlu0 %650 }
 0x26b   : > { %v2117_v6 = vmul.f32 %v1092_v57, %v753_v11  ;;  %v2119_v14 = vmul.f32 %v1096_v8, %v753_v11  ;;  %v1103_v57 = vmul.f32 %v1100_v62, %v2034_v15  ;;  %v860_v11 = vrot.slane %v1848_v55, %v1912_v60 }
 0x26c   : > { %1010 = vrot.lane.b32.xlu1 %v1003_v35, %s1631_s26  ;;  %v864_v35 = vrot.slane %v1852_v58, %v1912_v60  ;;  %v1150_v15 = vmul.f32 %v2157_v56, %v1121_v28 }
 0x26e   : > { %1249 = vperm.xlu0 %1486, %v1246_v5   ;;  %v2189_v62 = vpop.permute.xlu0 %699 }
 0x26f   : > { %v823_v8 = vpop.permute.xlu1 %822 }
 0x270   : > { %v2132_v9 = vmul.f32 %v828_v24, %v823_v8  ;;  %v2134_v0 = vmul.f32 %v832_v7, %v823_v8  ;;  %1060 = vrot.lane.b32.xlu1 %v1053_v45, %s1631_s26  ;;  %v910_v24 = vrot.slane %v2167_v47, %v1892_v44  ;;  %v1151_v45 = vmul.f32 %v2174_v36, %v1121_v28 }
 0x274   : > { %v839_v25 = vpop.permute.xlu1 %838  ;;  %1107 = vrot.lane.b32.xlu1 %v1101_v40, %s1631_s26  ;;  %v2191_v40 = vpop.permute.xlu0 %778 }
 0x275   : > { %v2145_v32 = vmul.f32 %v844_v18, %v839_v25  ;;  %v2147_v38 = vmul.f32 %v848_v10, %v839_v25 }
 0x278   : > { %1111 = vrot.lane.b32.xlu1 %v1103_v57, %s1631_s26  ;;  %v2193_v10 = vpop.permute.xlu0 %870 }
 0x279   : > { %v855_v5 = vpop.permute.xlu1 %854 }
 0x27a   : > { %v2169_v43 = vmul.f32 %v860_v11, %v855_v5  ;;  %v2171_v4 = vmul.f32 %v864_v35, %v855_v5 }
 0x27c   : > { %2389 = vst [vmem:[#allocation14_spill] sm:$0xff] %v2171_v4  ;;  %1156 = vrot.lane.b32.xlu1 %v1150_v15, %s1631_s26 }
 0x27e   : > { %v905_v7 = vpop.permute.xlu1 %904 }
 0x27f   : > { %v2181_v31 = vmul.f32 %v910_v24, %v905_v7 }
 0x280   : > { %1158 = vrot.lane.b32.xlu1 %v1151_v45, %s1631_s26 }
 0x281   : > { %2390 = vst [vmem:[#allocation15_spill] sm:$0xff] %v2181_v31 }
 0x283   : > { %v921_v8 = vpop.permute.xlu1 %920 }
 0x284   : > { %v2186_v18 = vmul.f32 %v926_v21, %v921_v8  ;;  %1231 = vperm.xlu1 %1485, %v1856_v63  }
 0x286   : > { %2391 = vst [vmem:[#allocation16_spill] sm:$0xff] %v2186_v18 }
 0x2a8   : > { %v375_v28 = vpop.permute.xlu1 %374  ;;  %v377_v25 = vpop.permute.xlu0 %376 }
 0x2a9   : > { %v381_v45 = vsel %vm380_vm10, %v375_v28, %v377_v25 }
 0x2aa   : > { %v385_v31 = vadd.f32 %v381_v45, %v1947_v41 }
 0x2ac   : > { %v379_v52 = vpop.permute.xlu1 %378  ;;  %v429_v23 = vpop.permute.xlu0 %428 }
 0x2ad   : > { %v382_v28 = vsel %vm380_vm10, %v377_v25, %v379_v52 }
 0x2b0   : > { %v478_v57 = vpop.permute.xlu0 %477  ;;  %v425_v11 = vpop.permute.xlu1 %424 }
 0x2b4   : > { %v525_v35 = vpop.permute.xlu0 %524  ;;  %v427_v5 = vpop.permute.xlu1 %426 }
 0x2b5   : > { %v430_v18 = vsel %vm380_vm10, %v425_v11, %v427_v5 }
 0x2b8   : > { %v895_v15 = vpop.permute.xlu0 %894  ;;  %v474_v24 = vpop.permute.xlu1 %473 }
 0x2b9   : > { %v898_v63 = vsel %vm896_vm9, %v1894_v46, %v895_v15  ;;  %v434_v15 = vadd.f32 %v430_v18, %v385_v31 }
 0x2ba   : > { %v2200_v21 = vsel %vm1812_vm4, %v898_v63, 0.0  ;;  %v431_v63 = vsel %vm380_vm10, %v427_v5, %v429_v23 }
 0x2bb   : > { %2392 = vst [vmem:[#allocation17_spill] sm:$0xff] %v2200_v21  ;;  %v914_v42 = vrot.slane %v2200_v21, %v1892_v44  ;;  %v930_v37 = vrot.slane %v2200_v21, %v1903_v53  ;;  %v386_v44 = vadd.f32 %v382_v28, %v1949_v48 }
 0x2bc   : > { %v476_v47 = vpop.permute.xlu1 %475 }
 0x2bd   : > { %v2208_v4 = vmul.f32 %v914_v42, %v905_v7  ;;  %v2210_v46 = vmul.f32 %v930_v37, %v921_v8  ;;  %v479_v34 = vsel %vm380_vm10, %v474_v24, %v476_v47  ;;  %v480_v11 = vsel %vm380_vm10, %v476_v47, %v478_v57 }
 0x2be   : > { %v483_v60 = vadd.f32 %v479_v34, %v434_v15  ;;  %v435_v42 = vadd.f32 %v431_v63, %v386_v44  ;;  %v656_v47 = vrot.slane %v1844_v51, %v1903_v53 }
 0x2c0   : > { %v523_v21 = vpop.permute.xlu1 %522  ;;  %v484_v45 = vadd.f32 %v480_v11, %v435_v42  ;;  %v800_v11 = vmul.f32 %v2174_v36, %v2191_v40 }
 0x2c1   : > { %v528_v41 = vsel %vm380_vm10, %v523_v21, %v525_v35 }
 0x2c2   : > { %v532_v7 = vadd.f32 %v528_v41, %v483_v60  ;;  %v661_v60 = vmul.f32 %v656_v47, %v651_v22 }
 0x2c4   : > { %v566_v37 = vadd.f32 %v1982_v26, %v532_v7  ;;  %v527_v8 = vpop.permute.xlu1 %526 }
 0x2c5   : > { %v529_v25 = vsel %vm380_vm10, %v525_v35, %v527_v8  ;;  %v2395_v8 = vld [vmem:[#allocation14_spill] sm:$0xff] }
 0x2c6   : > { %v582_v31 = vadd.f32 %v1928_v19, %v566_v37  ;;  %v533_v18 = vadd.f32 %v529_v25, %v484_v45  ;;  %v660_v19 = vrot.slane %v1839_v49, %v1903_v53  ;;  %v2394_v45 = vld [vmem:[#allocation13_spill] sm:$0xff] }
 0x2c8   : > { %v598_v52 = vadd.f32 %v1999_v33, %v582_v31  ;;  %v567_v48 = vadd.f32 %v1984_v27, %v533_v18  ;;  %v662_v27 = vmul.f32 %v660_v19, %v651_v22  ;;  %v2396_v31 = vld [vmem:[#allocation15_spill] sm:$0xff] }
 0x2c9   : > { %v953_v5 = vpop.permute.xlu0 %952 }
 0x2ca   : > { %v614_v23 = vadd.f32 %v2013_v3, %v598_v52  ;;  %v583_v44 = vadd.f32 %v1930_v20, %v567_v48  ;;  %v721_v20 = vmul.f32 %v2095_v61, %v2189_v62  ;;  %v2397_v52 = vld [vmem:[#allocation16_spill] sm:$0xff] }
 0x2cc   : > { %v647_v26 = vadd.f32 %v2049_v29, %v614_v23  ;;  %v599_v57 = vadd.f32 %v2001_v50, %v583_v44 }
 0x2cd   : > { %v1170_v28 = vpop.permute.xlu0 %1169 }
 0x2ce   : > { %v663_v35 = vadd.f32 %v661_v60, %v647_v26  ;;  %v615_v33 = vadd.f32 %v2015_v2, %v599_v57  ;;  %v722_v2 = vmul.f32 %v2110_v54, %v2189_v62 }
 0x2d0   : > { %v679_v24 = vadd.f32 %v2066_v59, %v663_v35  ;;  %v648_v51 = vadd.f32 %v2051_v30, %v615_v33  ;;  %v799_v30 = vmul.f32 %v2157_v56, %v2191_v40 }
 0x2d2   : > { %v695_v3 = vadd.f32 %v2085_v13, %v679_v24  ;;  %v664_v29 = vadd.f32 %v662_v27, %v648_v51 }
 0x2d4   : > { %v723_v21 = vadd.f32 %v721_v20, %v695_v3  ;;  %v680_v50 = vadd.f32 %v2068_v1, %v664_v29  ;;  %v1174_v1 = vpop.permute.xlu0 %1173 }
 0x2d5   : > { %v937_v49 = vpop.permute.xlu1 %936 }
 0x2d6   : > { %v696_v22 = vadd.f32 %v2087_v17, %v680_v50  ;;  %v749_v59 = vadd.f32 %v2104_v39, %v723_v21  ;;  %v876_v39 = vrot.slane %v1848_v55, %v1925_v12 }
 0x2d8   : > { %v724_v34 = vadd.f32 %v722_v2, %v696_v22  ;;  %v775_v61 = vadd.f32 %v2117_v6, %v749_v59  ;;  %v2260_v7 = vpop.permute.xlu0 %1215 }
 0x2da   : > { %v750_v13 = vadd.f32 %v2106_v16, %v724_v34  ;;  %v801_v15 = vadd.f32 %v799_v30, %v775_v61  ;;  %v2246_v63 = vpop.permute.xlu1 %1183  ;;  %v881_v16 = vmul.f32 %v876_v39, %v2193_v10  ;;  %v2401_v39 = vld [vmem:[#allocation11_spill] sm:$0xff] }
 0x2dc   : > { %v776_v54 = vadd.f32 %v2119_v14, %v750_v13  ;;  %v835_v17 = vadd.f32 %v2132_v9, %v801_v15  ;;  %v880_v14 = vrot.slane %v1852_v58, %v1925_v12  ;;  %v1013_v47 = vpop.permute.xlu0 %1012 }
 0x2de   : > { %v802_v56 = vadd.f32 %v800_v11, %v776_v54  ;;  %v851_v62 = vadd.f32 %v2145_v32, %v835_v17  ;;  %v882_v40 = vmul.f32 %v880_v14, %v2193_v10  ;;  %v2393_v32 = vld [vmem:[#allocation12_spill] sm:$0xff]  ;;  %v2398_v10 = vld [vmem:[#allocation17_spill] sm:$0xff] }
 0x2df   : > { %v2255_v6 = vpop.permute.xlu1 %1199  ;;  %v942_v37 = vrot.slane %v2394_v45, %v2393_v32  ;;  %v946_v60 = vrot.slane %v2398_v10, %v2393_v32  ;;  %v962_v57 = vrot.slane %v2398_v10, %v1925_v12 }
 0x2e0   : > { %v836_v41 = vadd.f32 %v2134_v0, %v802_v56  ;;  %v867_v42 = vadd.f32 %v2169_v43, %v851_v62  ;;  %v958_v43 = vrot.slane %v2394_v45, %v1925_v12  ;;  %v1059_v20 = vpop.permute.xlu0 %1058 }
 0x2e1   : > { %v947_v58 = vmul.f32 %v942_v37, %v937_v49  ;;  %v948_v35 = vmul.f32 %v946_v60, %v937_v49  ;;  %v964_v24 = vmul.f32 %v962_v57, %v953_v5 }
 0x2e2   : > { %v852_v9 = vadd.f32 %v2147_v38, %v836_v41  ;;  %v883_v36 = vadd.f32 %v881_v16, %v867_v42  ;;  %v963_v23 = vmul.f32 %v958_v43, %v953_v5 }
 0x2e3   : > { %v1172_v55 = vpop.permute.xlu1 %1171 }
 0x2e4   : > { %v868_v25 = vadd.f32 %v2395_v8, %v852_v9  ;;  %v917_v0 = vadd.f32 %v2396_v31, %v883_v36  ;;  %v1063_v21 = vpop.permute.xlu0 %1062  ;;  %v1177_v2 = vsel %vm1175_vm11, %v1172_v55, %v1174_v1 }
 0x2e5   : > { %v1181_v13 = vsel %vm1828_vm7, %v1177_v2, 0.0 }
 0x2e6   : > { %v884_v18 = vadd.f32 %v882_v40, %v868_v25  ;;  %v933_v48 = vadd.f32 %v2397_v52, %v917_v0  ;;  %v1193_v62 = vrot.slane %v1181_v13, %v2401_v39  ;;  %v1209_v14 = vrot.slane %v1181_v13, %v1903_v53 }
 0x2e7   : > { %v1009_v38 = vpop.permute.xlu1 %1008  ;;  %v1225_v37 = vrot.slane %v1181_v13, %v2393_v32 }
 0x2e8   : > { %v918_v44 = vadd.f32 %v2208_v4, %v884_v18  ;;  %v949_v26 = vadd.f32 %v947_v58, %v933_v48  ;;  %v1176_v4 = vsel %vm1175_vm11, %v1170_v28, %v1172_v55  ;;  %v1195_v18 = vmul.f32 %v1193_v62, %v2246_v63 }
 0x2e9   : > { %v1180_v5 = vsel %vm1820_vm5, %v1176_v4, 0.0  ;;  %v1211_v58 = vmul.f32 %v1209_v14, %v2255_v6  ;;  %v1227_v60 = vmul.f32 %v1225_v37, %v2260_v7 }
 0x2ea   : > { %v934_v19 = vadd.f32 %v2210_v46, %v918_v44  ;;  %v965_v33 = vadd.f32 %v963_v23, %v949_v26  ;;  %v1110_v46 = vpop.permute.xlu0 %1109  ;;  %v1189_v56 = vrot.slane %v1180_v5, %v2401_v39  ;;  %v1205_v42 = vrot.slane %v1180_v5, %v1903_v53 }
 0x2eb   : > { %v1011_v27 = vpop.permute.xlu1 %1010  ;;  %v1221_v45 = vrot.slane %v1180_v5, %v2393_v32  ;;  %v1237_v32 = vrot.slane %v1180_v5, %v1925_v12 }
 0x2ec   : > { %v950_v51 = vadd.f32 %v948_v35, %v934_v19  ;;  %v1015_v59 = vsel %vm1014_vm12, %v1009_v38, %v1011_v27  ;;  %v1016_v30 = vsel %vm1014_vm12, %v1011_v27, %v1013_v47  ;;  %v1194_v43 = vmul.f32 %v1189_v56, %v2246_v63 }
 0x2ed   : > { %v1019_v54 = vadd.f32 %v1015_v59, %v965_v33  ;;  %v1210_v48 = vmul.f32 %v1205_v42, %v2255_v6  ;;  %v1241_v38 = vrot.slane %v1181_v13, %v1925_v12  ;;  %v1226_v10 = vmul.f32 %v1221_v45, %v2260_v7 }
 0x2ee   : > { %v966_v3 = vadd.f32 %v964_v24, %v950_v51  ;;  %v1161_v9 = vpop.permute.xlu0 %1160 }
 0x2ef   : > { %v1061_v29 = vpop.permute.xlu1 %1060 }
 0x2f0   : > { %v1020_v49 = vadd.f32 %v1016_v30, %v966_v3  ;;  %v1064_v15 = vsel %vm1014_vm12, %v1059_v20, %v1061_v29  ;;  %v1065_v11 = vsel %vm1014_vm12, %v1061_v29, %v1063_v21 }
 0x2f1   : > { %v1068_v16 = vadd.f32 %v1064_v15, %v1019_v54 }
 0x2f2   : > { %v1069_v41 = vadd.f32 %v1065_v11, %v1020_v49  ;;  %v1250_v35 = vpop.permute.xlu0 %1249 }
 0x2f3   : > { %v1108_v50 = vpop.permute.xlu1 %1107 }
 0x2f4   : > { %v1113_v1 = vsel %vm1014_vm12, %v1108_v50, %v1110_v46 }
 0x2f5   : > { %v1117_v36 = vadd.f32 %v1113_v1, %v1068_v16 }
 0x2f7   : > { %v1112_v22 = vpop.permute.xlu1 %1111 }
 0x2f8   : > { %v1114_v17 = vsel %vm1014_vm12, %v1110_v46, %v1112_v22 }
 0x2f9   : > { %v1118_v55 = vadd.f32 %v1114_v17, %v1069_v41 }
 0x2fb   : > { %v1157_v28 = vpop.permute.xlu1 %1156 }
 0x2ff   : > { %v1159_v40 = vpop.permute.xlu1 %1158 }
 0x300   : > { %v1162_v8 = vsel %vm1014_vm12, %v1157_v28, %v1159_v40  ;;  %v1163_v25 = vsel %vm1014_vm12, %v1159_v40, %v1161_v9 }
 0x301   : > { %v1166_v31 = vadd.f32 %v1162_v8, %v1117_v36  ;;  %v1167_v0 = vadd.f32 %v1163_v25, %v1118_v55 }
 0x303   : > { %v1196_v53 = vadd.f32 %v1194_v43, %v1166_v31  ;;  %v1197_v52 = vadd.f32 %v1195_v18, %v1167_v0  ;;  %v1232_v47 = vpop.permute.xlu1 %1231 }
 0x304   : > { %v1242_v63 = vmul.f32 %v1237_v32, %v1232_v47  ;;  %v1243_v26 = vmul.f32 %v1241_v38, %v1232_v47 }
 0x305   : > { %v1212_v23 = vadd.f32 %v1210_v48, %v1196_v53  ;;  %v1213_v44 = vadd.f32 %v1211_v58, %v1197_v52 }
 0x307   : > { %v1228_v57 = vadd.f32 %v1226_v10, %v1212_v23  ;;  %v1229_v19 = vadd.f32 %v1227_v60, %v1213_v44 }
 0x309   : > { %v1244_v6 = vadd.f32 %v1242_v63, %v1228_v57  ;;  %v1245_v33 = vadd.f32 %v1243_v26, %v1229_v19 }
 0x30b   : > { %v1252_v27 = vadd.f32 %v1250_v35, %v1244_v6  ;;  %v1253_v12 = vadd.f32 %v1250_v35, %v1245_v33 }
 0x30d   : > { %1254 = vst [vmem:[%s186_s9] sm:$0xff] %v1252_v27  ;;  %1255 = vst [vmem:[%s186_s9 + $0x8] sm:$0xff] %v1253_v12 }
 0x30e   : > { %1534 = shalt.err (!%p1531_p4)
}
 0x30f   : > { %s1535_s29 = scalar_lea.hbm %s2310_s7, 256  ;;  %s1539_s22 = scalar_lea.hbm %s2357_s3, 512 }
 0x310   : > { %p1536_p5 = scmp.ne.s32.totalorder %s2310_s7, %s1535_s29  ;;  %p1540_p0 = scmp.lt.u32.totalorder %s2310_s7, %s2357_s3 }
 0x311   : > { %p1541_p1 = scmp.lt.u32.totalorder %s1539_s22, %s1535_s29  ;;  %p1543_p6 = scmp.lt.u32.totalorder %s1535_s29, %s2310_s7 }
 0x312   : > { %p1537_p8 = pnand %p1536_p5, %p2402_p11 }
 0x313   : > { %p1542_p3 = por %p1541_p1, %p1540_p0 }
 0x314   : > { %p1538_p9 = pneg %p1537_p8 }
 0x315   : > { %p1544_p12 = por %p1543_p6, %p1542_p3 }
 0x317   : > { %p1545_p13 = pnand %p1544_p12, %p1538_p9 }
 0x319   : > { %1548 = shalt.err (!%p1545_p13)
}
 0x31a   : > { %1361 = dma.vmem_to_hbm [thread:$0]  (%p2402_p11), %s2312_s4, 256, %s2310_s7, %s1257_s8  }
 0x31b PF: > { %s1283_s28 = sand.u32 1, %s1575_s12   ;;  %p2403_p7 = scmp.ne.s32.totalorder %s2372_s25, 0 }
 0x31c   : > { %p2404_p10 = scmp.ge.s32.totalorder %s1587_s15, 2  ;;  %s1284_s30 = scalar_lea.sflag [#allocation5], %s1283_s28 }
 0x31e   : > { %p1368_p2 = pnand %p2404_p10, %p2403_p7 }
 0x320   : > { %1570 = dma.done.wait (!%p1368_p2), %s1284_s30, 256  }
 0x321   : > { %1572 = vsyncadd (!%p1368_p2), %s1284_s30, 4294967040  ;;  %p16_p4 = scmp.ge.s32.totalorder %s1681_s18, 4   ;;  %s2405_s12 = smov %s1579_s13 }
 0x322   : > { %s2406_s13 = smov %s1583_s14  ;;  %s2407_s14 = smov %s1693_s21 }
 0x323   : > { %s2408_s15 = smov %s1681_s18  ;;  %18 = sbr.rel (!%p16_p4) target bundleno = 5 (0x5), region = 77 }
 0x32a   :  { %1289 = vsyncpa [#allocation4], 1 }
 0x32b   :  { %1291 = vsyncpa [#allocation4 + $0x1], 1 }
 0x32c   :  { %1292 = vsyncpa [#allocation5], 1 }
 0x32d   :  { %1294 = vsyncpa [#allocation5 + $0x1], 1 }

</bundles_post_ra>
